<compile_context>
chip_gen: v5e
topology: v5e:2x2
jax: 0.10.0
libtpu: 0.0.40
codegen_flags: <defaults>
</compile_context>

<pallas_src>
import functools

import jax
import jax.numpy as jnp
from jax.experimental import pallas as pl
from jax.experimental.pallas import tpu as pltpu


_EPS = 1e-5
_VMEM_LIMIT = 32 * 1024 * 1024      # explicit scoped-VMEM limit, safe on v5e/v6e/v7x
_TILE_BUDGET = 16 * 1024 * 1024     # budget for the double-buffered row tiles


def _round_up(x, m):
    return ((x + m - 1) // m) * m


# --------------------------- Pallas kernels --------------------------------

def _pw_conv_kernel(x_ref, w_ref, s_ref, b_ref, o_ref, *, relu):
    """Pointwise (1x1) conv tile: bf16 (tm,Cin)@(Cin,Cout) MXU dot, f32 BN."""
    y = jnp.dot(x_ref[...].astype(jnp.bfloat16), w_ref[...],
                preferred_element_type=jnp.float32)
    y = y * s_ref[...] + b_ref[...]
    if relu:
        y = jnp.maximum(y, 0.0)
    o_ref[...] = y.astype(o_ref.dtype)


def _pw_conv_res_kernel(x_ref, w_ref, s_ref, b_ref, r_ref, o_ref):
    """Last 1x1 conv with fused BN + residual add + final ReLU."""
    y = jnp.dot(x_ref[...].astype(jnp.bfloat16), w_ref[...],
                preferred_element_type=jnp.float32)
    y = y * s_ref[...] + b_ref[...] + r_ref[...].astype(jnp.float32)
    o_ref[...] = jnp.maximum(y, 0.0).astype(o_ref.dtype)


def _conv3x3_band_kernel(x_ref, w_ref, s_ref, b_ref, o_ref, *,
                         band, wout, cin, stride):
    """A band of output rows of a 3x3 conv (pad=1) with fused BN + ReLU.

    x_ref: the whole zero-padded image of one batch element (single ref; the
           block index depends only on the batch axis, so it is DMA'd once per
           batch element).  For stride=2 the wrapper presents a column-paired
           layout (..., Wp//2, 2*Cin) so every tap is a contiguous slice.
    w_ref: (3, 3*Cin, Cout) bf16 — per ki the three kj taps stacked along K.
    Compute: three (band*Wout, 3*Cin) @ (3*Cin, Cout) MXU dots per band.
    """
    r0 = pl.multiple_of(pl.program_id(1) * band, band)
    if stride == 1:
        rows = x_ref[0, pl.ds(r0, band + 2), :, :]           # (band+2, W+2, C)
        taps = [rows[ki:ki + band] for ki in range(3)]       # (band, W+2, C)
        patches = [
            jnp.concatenate([t[:, 0:wout, :], t[:, 1:wout + 1, :],
                             t[:, 2:wout + 2, :]], axis=-1)
            for t in taps
        ]
    else:  # stride == 2: paired cols, x[..., p, 0:C] = col 2p, [..., C:2C] = col 2p+1
        rows = x_ref[0, pl.ds(2 * r0, 2 * band + 2), :, :]   # (2b+2, Wq, 2C)
        rows = rows.reshape(band + 1, 2, rows.shape[1], rows.shape[2])
        taps = [rows[0:band, 0], rows[0:band, 1], rows[1:band + 1, 0]]
        patches = [
            jnp.concatenate([t[:, 0:wout, :], t[:, 1:wout + 1, 0:cin]], axis=-1)
            for t in taps
        ]
    acc = None
    for ki in range(3):
        p = patches[ki].reshape(band * wout, 3 * cin).astype(jnp.bfloat16)
        t = jnp.dot(p, w_ref[ki], preferred_element_type=jnp.float32)
        acc = t if acc is None else acc + t
    y = jnp.maximum(acc * s_ref[...] + b_ref[...], 0.0)
    # TODO(synk): for Cout < 128 a lane-dense (band, Wout*Cout) store would
    # avoid masked partial stores; skipped to keep the in-kernel reshape simple.
    o_ref[0] = y.reshape(band, wout, -1).astype(o_ref.dtype)


# ------------------------------ wrappers ------------------------------------

def _choose_row_tiles(m, per_row_bytes, budget):
    """Row tile for the 1x1 convs: biggest tile within the VMEM budget, grid
    kept even (>= 2) so both v7x TensorCores get work."""
    tm = max(8, min(1024, budget // max(per_row_bytes, 1)))
    tm = min(tm, _round_up(m, 8))
    g = -(-m // tm)
    if g == 1 and m >= 16:
        g = 2
    if g > 1 and g % 2:
        g += 1
    tm = _round_up(-(-m // g), 8)
    return tm, g, tm * g


def conv1x1_bn(x2d, w, scale, shift, *, relu, residual=None,
               out_dtype=jnp.float32):
    """Fused 1x1-conv + folded-BN (+ optional residual add) (+ ReLU).

    x2d: (M, Cin) NHWC-flattened activations (f32 or bf16); w: (Cin, Cout);
    residual (optional): (M, Cout) f32.  Row-tiled matmul with a VMEM-budgeted
    tile size and an explicit vmem_limit_bytes (generation safe).
    """
    m, cin = x2d.shape
    cout = w.shape[1]
    w = w.astype(jnp.bfloat16)

    xbytes = jnp.dtype(x2d.dtype).itemsize
    obytes = jnp.dtype(out_dtype).itemsize
    per_row = 2 * (cin * xbytes + cout * obytes)
    if residual is not None:
        per_row += 2 * cout * jnp.dtype(residual.dtype).itemsize
    budget = max(_TILE_BUDGET - 2 * cin * cout * 2, 2 << 20)
    tm, g, mp = _choose_row_tiles(m, per_row, budget)

    def pad_rows(a):
        return jnp.pad(a, ((0, mp - m), (0, 0))) if mp != m else a

    args = [pad_rows(x2d), w,
            scale.reshape(1, cout).astype(jnp.float32),
            shift.reshape(1, cout).astype(jnp.float32)]
    in_specs = [
        pl.BlockSpec((tm, cin), lambda i: (i, 0)),
        pl.BlockSpec((cin, cout), lambda i: (0, 0)),
        pl.BlockSpec((1, cout), lambda i: (0, 0)),
        pl.BlockSpec((1, cout), lambda i: (0, 0)),
    ]
    if residual is not None:
        args.append(pad_rows(residual))
        in_specs.append(pl.BlockSpec((tm, cout), lambda i: (i, 0)))
        kernel = _pw_conv_res_kernel
    else:
        kernel = functools.partial(_pw_conv_kernel, relu=relu)

    out = pl.pallas_call(
        kernel,
        out_shape=jax.ShapeDtypeStruct((mp, cout), out_dtype),
        grid=(g,),
        in_specs=in_specs,
        out_specs=pl.BlockSpec((tm, cout), lambda i: (i, 0)),
        compiler_params=pltpu.CompilerParams(
            dimension_semantics=("parallel",),
            vmem_limit_bytes=_VMEM_LIMIT),
    )(*args)
    return out[:m] if mp != m else out


def conv3x3_bn_relu(x_nhwc, w9, scale, shift, *, stride=1,
                    out_dtype=jnp.bfloat16):
    """3x3 conv (pad=1, stride in {1,2}) + folded-BN + ReLU, banded.

    x_nhwc: (N, H, W, Cin); w9: (3, 3*Cin, Cout).  Grid = (N, Hout/band); each
    step emits `band` output rows from 3 K-stacked MXU dots.  stride=2 is done
    in-kernel on a column-paired view of the padded image (no over-compute).
    """
    n, h, w, cin = x_nhwc.shape
    cout = w9.shape[-1]
    assert stride in (1, 2)
    if stride == 2:
        assert h % 2 == 0 and w % 2 == 0, "stride-2 path assumes even H/W"
    hout, wout = h // stride, w // stride

    # TODO(synk): the W boundary could be masked in-kernel to avoid this
    # full-activation pad pass; kept for simplicity (single fused XLA pad).
    xp = jnp.pad(x_nhwc, ((0, 0), (1, 1), (1, 1), (0, 0)))
    if stride == 2:
        xp = xp.reshape(n, h + 2, (w + 2) // 2, 2 * cin)   # contiguous, free

    band = hout
    while band % 2 == 0 and (band // 2) * wout >= 512:
        band //= 2
    n_bands = hout // band
    hp, wq, cq = xp.shape[1], xp.shape[2], xp.shape[3]

    out = pl.pallas_call(
        functools.partial(_conv3x3_band_kernel, band=band, wout=wout,
                          cin=cin, stride=stride),
        out_shape=jax.ShapeDtypeStruct((n, hout, wout, cout), out_dtype),
        grid=(n, n_bands),
        in_specs=[
            pl.BlockSpec((1, hp, wq, cq), lambda b, r: (b, 0, 0, 0)),
            pl.BlockSpec((3, 3 * cin, cout), lambda b, r: (0, 0, 0)),
            pl.BlockSpec((1, cout), lambda b, r: (0, 0)),
            pl.BlockSpec((1, cout), lambda b, r: (0, 0)),
        ],
        out_specs=pl.BlockSpec((1, band, wout, cout), lambda b, r: (b, r, 0, 0)),
        compiler_params=pltpu.CompilerParams(
            dimension_semantics=("parallel", "parallel"),
            vmem_limit_bytes=_VMEM_LIMIT),
    )(xp, w9.astype(jnp.bfloat16),
      scale.reshape(1, cout).astype(jnp.float32),
      shift.reshape(1, cout).astype(jnp.float32))
    return out


# ----------------------------- forward -------------------------------------

def _fold_bn(gamma, beta, mean, var):
    s = gamma * jax.lax.rsqrt(var + _EPS)
    return s, beta - mean * s


def bottleneck_forward(x, params, *, stride=1, downsampling=False,
                       expansion=4):
    """Forward pass of the PyTorch `Bottleneck` module. x: (N, Cin, H, W)."""
    n, cin, h, w = x.shape
    places = params["w1"].shape[0]
    cexp = places * expansion

    s1, b1 = _fold_bn(*params["bn1"])
    s2, b2 = _fold_bn(*params["bn2"])
    s3, b3 = _fold_bn(*params["bn3"])

    # TODO(synk): a full ResNet would keep NHWC end-to-end across blocks; the
    # transposes here only preserve the module's NCHW interface.
    x_nhwc = jnp.transpose(x, (0, 2, 3, 1)).astype(jnp.float32)
    x2d = x_nhwc.reshape(n * h * w, cin)

    # conv1 (1x1) + BN + ReLU, fused; bf16 activation handed downstream.
    w1 = params["w1"].reshape(places, cin).T                    # (Cin, places)
    h1 = conv1x1_bn(x2d, w1, s1, b1, relu=True, out_dtype=jnp.bfloat16)
    h1 = h1.reshape(n, h, w, places)

    # conv2 (3x3, pad=1, stride) + BN + ReLU; stride handled in-kernel.
    w2 = jnp.transpose(params["w2"], (2, 3, 1, 0)).reshape(3, 3 * places, places)
    h2 = conv3x3_bn_relu(h1, w2, s2, b2, stride=stride, out_dtype=jnp.bfloat16)
    ho, wo = h2.shape[1], h2.shape[2]
    h2_2d = h2.reshape(n * ho * wo, places)

    # residual branch
    if downsampling:
        sd, bd = _fold_bn(*params["bnd"])
        # TODO(synk): the projection shortcut's stride-2 pixel selection is
        # still a wrapper-side slice (1/stride^2-sized extra HBM pass).
        xd = x_nhwc[:, ::stride, ::stride, :] if stride != 1 else x_nhwc
        wd = params["wd"].reshape(cexp, cin).T                  # (Cin, cexp)
        res2d = conv1x1_bn(xd.reshape(n * ho * wo, cin), wd, sd, bd,
                           relu=False, out_dtype=jnp.float32)
    else:
        assert stride == 1 and cin == cexp, "identity residual needs matching shapes"
        res2d = x2d

    # conv3 (1x1) + BN + residual add + final ReLU, fused in one kernel.
    w3 = params["w3"].reshape(cexp, places).T                   # (places, cexp)
    out2d = conv1x1_bn(h2_2d, w3, s3, b3, relu=True, residual=res2d,
                       out_dtype=jnp.float32)

    out = out2d.reshape(n, ho, wo, cexp)
    return jnp.transpose(out, (0, 3, 1, 2))                     # back to NCHW


# --------------------------- parameters ------------------------------------

def init_params(key, in_places, places, expansion=4, downsampling=False):
    cexp = places * expansion
    ks = jax.random.split(key, 8)

    def conv_w(k, cout, cin, kk):
        bound = 1.0 / float(cin * kk * kk) ** 0.5
        return jax.random.uniform(k, (cout, cin, kk, kk), jnp.float32,
                                  -bound, bound)

    def bn_p(k, c):
        k1, k2, k3, k4 = jax.random.split(k, 4)
        gamma = jax.random.uniform(k1, (c,), jnp.float32, 0.5, 1.5)
        beta = 0.1 * jax.random.normal(k2, (c,), jnp.float32)
        mean = 0.1 * jax.random.normal(k3, (c,), jnp.float32)
        var = jax.random.uniform(k4, (c,), jnp.float32, 0.5, 1.5)
        return (gamma, beta, mean, var)

    p = {
        "w1": conv_w(ks[0], places, in_places, 1), "bn1": bn_p(ks[1], places),
        "w2": conv_w(ks[2], places, places, 3),    "bn2": bn_p(ks[3], places),
        "w3": conv_w(ks[4], cexp, places, 1),      "bn3": bn_p(ks[5], cexp),
    }
    if downsampling:
        p["wd"] = conv_w(ks[6], cexp, in_places, 1)
        p["bnd"] = bn_p(ks[7], cexp)
    return p


# --------------------------- pure-JAX reference ------------------------------

def bottleneck_ref(x, p, *, stride, downsampling):
    dn = ("NCHW", "OIHW", "NCHW")
    prec = jax.lax.Precision.HIGHEST

    def conv(a, w, s, pad):
        return jax.lax.conv_general_dilated(
            a, w, (s, s), [(pad, pad), (pad, pad)],
            dimension_numbers=dn, precision=prec)

    def bn(a, prm):
        g, b, m, v = prm
        sc = g * jax.lax.rsqrt(v + _EPS)
        return a * sc[None, :, None, None] + (b - m * sc)[None, :, None, None]

    out = jnp.maximum(bn(conv(x, p["w1"], 1, 0), p["bn1"]), 0.0)
    out = jnp.maximum(bn(conv(out, p["w2"], stride, 1), p["bn2"]), 0.0)
    out = bn(conv(out, p["w3"], 1, 0), p["bn3"])
    res = bn(conv(x, p["wd"], stride, 0), p["bnd"]) if downsampling else x
    return jnp.maximum(out + res, 0.0)


# ------------------------------- main --------------------------------------

if __name__ == "__main__":
    key = jax.random.PRNGKey(0)
    kx1, kp1, kx2, kp2 = jax.random.split(key, 4)

    # Tolerances: operands feed the MXU as bf16 (f32 accumulation / epilogue).
    ATOL, RTOL = 5e-2, 5e-2

    # Config A: identity residual (in_places == places*expansion), stride 1.
    N, CIN, H, W, PLACES = 2, 64, 16, 16, 16
    xA = jax.random.normal(kx1, (N, CIN, H, W), jnp.float32)
    pA = init_params(kp1, CIN, PLACES, downsampling=False)
    fwdA = jax.jit(functools.partial(bottleneck_forward,
                                     stride=1, downsampling=False))
    outA = jax.block_until_ready(fwdA(xA, pA))
    refA = bottleneck_ref(xA, pA, stride=1, downsampling=False)
    assert outA.shape == (N, PLACES * 4, H, W)
    assert bool(jnp.all(jnp.isfinite(outA)))
    errA = float(jnp.max(jnp.abs(outA - refA)))
    assert bool(jnp.allclose(outA, refA, atol=ATOL, rtol=RTOL)), errA

    # Config B: projection shortcut (downsampling) with stride 2.
    CIN2, PLACES2 = 32, 16
    xB = jax.random.normal(kx2, (N, CIN2, H, W), jnp.float32)
    pB = init_params(kp2, CIN2, PLACES2, downsampling=True)
    fwdB = jax.jit(functools.partial(bottleneck_forward,
                                     stride=2, downsampling=True))
    outB = jax.block_until_ready(fwdB(xB, pB))
    refB = bottleneck_ref(xB, pB, stride=2, downsampling=True)
    assert outB.shape == (N, PLACES2 * 4, H // 2, W // 2)
    assert bool(jnp.all(jnp.isfinite(outB)))
    errB = float(jnp.max(jnp.abs(outB - refB)))
    assert bool(jnp.allclose(outB, refB, atol=ATOL, rtol=RTOL)), errB

    print("KERNEL_OK")
</pallas_src>

<mosaic_0001>
module attributes {stable_mosaic.version = 11 : i64} {
  func.func @_pw_conv_kernel(%arg0: i32, %arg1: memref<256x64xf32, #tpu.memory_space<vmem>>, %arg2: memref<64x16xbf16, #tpu.memory_space<vmem>>, %arg3: memref<1x16xf32, #tpu.memory_space<vmem>>, %arg4: memref<1x16xf32, #tpu.memory_space<vmem>>, %arg5: memref<256x16xbf16, #tpu.memory_space<vmem>>) attributes {dimension_semantics = [#tpu.dimension_semantics<parallel>], iteration_bounds = array<i64: 2>, scalar_prefetch = 0 : i64, scratch_operands = 0 : i64, tpu.core_type = #tpu.core_type<tc>, window_params = [{transform_indices = @transform_0, window_bounds = array<i64: 256, 64>}, {pipeline_mode = #tpu.pipeline_mode<synchronous>, transform_indices = @transform_1, window_bounds = array<i64: 64, 16>}, {pipeline_mode = #tpu.pipeline_mode<synchronous>, transform_indices = @transform_2, window_bounds = array<i64: 1, 16>}, {pipeline_mode = #tpu.pipeline_mode<synchronous>, transform_indices = @transform_3, window_bounds = array<i64: 1, 16>}, {transform_indices = @transform_4, window_bounds = array<i64: 256, 16>}]} {
    %c0 = arith.constant 0 : index
    %c0_0 = arith.constant 0 : index
    %0 = vector.load %arg1[%c0, %c0_0] : memref<256x64xf32, #tpu.memory_space<vmem>>, vector<256x64xf32>
    %1 = arith.truncf %0 : vector<256x64xf32> to vector<256x64xbf16>
    %c0_1 = arith.constant 0 : index
    %c0_2 = arith.constant 0 : index
    %2 = vector.load %arg2[%c0_1, %c0_2] : memref<64x16xbf16, #tpu.memory_space<vmem>>, vector<64x16xbf16>
    %cst = arith.constant dense<0.000000e+00> : vector<256x16xf32>
    %3 = tpu.matmul %1, %2, %cst {dimension_numbers = #tpu.dot_dimension_numbers<[1], [0], [0], [1], [0, 0, 1, 1], [], []>} : vector<256x64xbf16>, vector<64x16xbf16>, vector<256x16xf32> -> vector<256x16xf32>
    %c0_3 = arith.constant 0 : index
    %c0_4 = arith.constant 0 : index
    %4 = vector.load %arg3[%c0_3, %c0_4] : memref<1x16xf32, #tpu.memory_space<vmem>>, vector<1x16xf32>
    %5 = vector.broadcast %4 : vector<1x16xf32> to vector<256x16xf32>
    %6 = arith.mulf %3, %5 : vector<256x16xf32>
    %c0_5 = arith.constant 0 : index
    %c0_6 = arith.constant 0 : index
    %7 = vector.load %arg4[%c0_5, %c0_6] : memref<1x16xf32, #tpu.memory_space<vmem>>, vector<1x16xf32>
    %8 = vector.broadcast %7 : vector<1x16xf32> to vector<256x16xf32>
    %9 = arith.addf %6, %8 : vector<256x16xf32>
    %cst_7 = arith.constant 0.000000e+00 : f32
    %10 = vector.broadcast %cst_7 : f32 to vector<256x16xf32>
    %11 = arith.maximumf %9, %10 : vector<256x16xf32>
    %12 = arith.truncf %11 : vector<256x16xf32> to vector<256x16xbf16>
    %c0_8 = arith.constant 0 : index
    %c0_9 = arith.constant 0 : index
    %13 = vector.load %arg5[%c0_8, %c0_9] : memref<256x16xbf16, #tpu.memory_space<vmem>>, vector<256x16xbf16>
    tpu.vector_store %arg5[%c0_8, %c0_9], %12 {strides = array<i32>} : memref<256x16xbf16, #tpu.memory_space<vmem>>, vector<256x16xbf16>,
    return
  }
  func.func @transform_0(%arg0: i32) -> (i32, i32) {
    %c0_i32 = arith.constant 0 : i32
    %c0_i32_0 = arith.constant 0 : i32
    return %arg0, %c0_i32 : i32, i32
  }
  func.func @transform_1(%arg0: i32) -> (i32, i32) {
    %c0_i32 = arith.constant 0 : i32
    %c0_i32_0 = arith.constant 0 : i32
    %c0_i32_1 = arith.constant 0 : i32
    return %c0_i32, %c0_i32_0 : i32, i32
  }
  func.func @transform_2(%arg0: i32) -> (i32, i32) {
    %c0_i32 = arith.constant 0 : i32
    %c0_i32_0 = arith.constant 0 : i32
    %c0_i32_1 = arith.constant 0 : i32
    return %c0_i32, %c0_i32_0 : i32, i32
  }
  func.func @transform_3(%arg0: i32) -> (i32, i32) {
    %c0_i32 = arith.constant 0 : i32
    %c0_i32_0 = arith.constant 0 : i32
    %c0_i32_1 = arith.constant 0 : i32
    return %c0_i32, %c0_i32_0 : i32, i32
  }
  func.func @transform_4(%arg0: i32) -> (i32, i32) {
    %c0_i32 = arith.constant 0 : i32
    %c0_i32_0 = arith.constant 0 : i32
    return %arg0, %c0_i32 : i32, i32
  }
}

module attributes {stable_mosaic.version = 11 : i64} {
  func.func @_conv3x3_band_kernel(%arg0: i32, %arg1: i32, %arg2: memref<1x18x18x16xbf16, #tpu.memory_space<vmem>>, %arg3: memref<3x48x16xbf16, #tpu.memory_space<vmem>>, %arg4: memref<1x16xf32, #tpu.memory_space<vmem>>, %arg5: memref<1x16xf32, #tpu.memory_space<vmem>>, %arg6: memref<1x16x16x16xbf16, #tpu.memory_space<vmem>>) attributes {dimension_semantics = [#tpu.dimension_semantics<parallel>, #tpu.dimension_semantics<parallel>], iteration_bounds = array<i64: 2, 1>, scalar_prefetch = 0 : i64, scratch_operands = 0 : i64, tpu.core_type = #tpu.core_type<tc>, window_params = [{transform_indices = @transform_0, window_bounds = array<i64: 1, 18, 18, 16>}, {pipeline_mode = #tpu.pipeline_mode<synchronous>, transform_indices = @transform_1, window_bounds = array<i64: 3, 48, 16>}, {pipeline_mode = #tpu.pipeline_mode<synchronous>, transform_indices = @transform_2, window_bounds = array<i64: 1, 16>}, {pipeline_mode = #tpu.pipeline_mode<synchronous>, transform_indices = @transform_3, window_bounds = array<i64: 1, 16>}, {transform_indices = @transform_4, window_bounds = array<i64: 1, 16, 16, 16>}]} {
    %c16_i32 = arith.constant 16 : i32
    %0 = arith.muli %arg1, %c16_i32 : i32
    %1 = tpu.assume_multiple %0, 16 : i32
    %c0 = arith.constant 0 : index
    %2 = arith.index_cast %1 : i32 to index
    %c0_0 = arith.constant 0 : index
    %c0_1 = arith.constant 0 : index
    %3 = vector.load %arg2[%c0, %2, %c0_0, %c0_1] : memref<1x18x18x16xbf16, #tpu.memory_space<vmem>>, vector<1x18x18x16xbf16>
    %4 = vector.shape_cast %3 : vector<1x18x18x16xbf16> to vector<18x18x16xbf16>
    %5 = vector.extract_strided_slice %4 {offsets = [0, 0, 0], sizes = [16, 18, 16], strides = [1, 1, 1]} : vector<18x18x16xbf16> to vector<16x18x16xbf16>
    %6 = vector.extract_strided_slice %4 {offsets = [1, 0, 0], sizes = [16, 18, 16], strides = [1, 1, 1]} : vector<18x18x16xbf16> to vector<16x18x16xbf16>
    %7 = vector.extract_strided_slice %4 {offsets = [2, 0, 0], sizes = [16, 18, 16], strides = [1, 1, 1]} : vector<18x18x16xbf16> to vector<16x18x16xbf16>
    %8 = vector.extract_strided_slice %5 {offsets = [0, 0, 0], sizes = [16, 16, 16], strides = [1, 1, 1]} : vector<16x18x16xbf16> to vector<16x16x16xbf16>
    %9 = vector.extract_strided_slice %5 {offsets = [0, 1, 0], sizes = [16, 16, 16], strides = [1, 1, 1]} : vector<16x18x16xbf16> to vector<16x16x16xbf16>
    %10 = vector.extract_strided_slice %5 {offsets = [0, 2, 0], sizes = [16, 16, 16], strides = [1, 1, 1]} : vector<16x18x16xbf16> to vector<16x16x16xbf16>
    %11 = tpu.concatenate %8, %9, %10 in 2 : vector<16x16x16xbf16>, vector<16x16x16xbf16>, vector<16x16x16xbf16> -> vector<16x16x48xbf16>
    %12 = vector.extract_strided_slice %6 {offsets = [0, 0, 0], sizes = [16, 16, 16], strides = [1, 1, 1]} : vector<16x18x16xbf16> to vector<16x16x16xbf16>
    %13 = vector.extract_strided_slice %6 {offsets = [0, 1, 0], sizes = [16, 16, 16], strides = [1, 1, 1]} : vector<16x18x16xbf16> to vector<16x16x16xbf16>
    %14 = vector.extract_strided_slice %6 {offsets = [0, 2, 0], sizes = [16, 16, 16], strides = [1, 1, 1]} : vector<16x18x16xbf16> to vector<16x16x16xbf16>
    %15 = tpu.concatenate %12, %13, %14 in 2 : vector<16x16x16xbf16>, vector<16x16x16xbf16>, vector<16x16x16xbf16> -> vector<16x16x48xbf16>
    %16 = vector.extract_strided_slice %7 {offsets = [0, 0, 0], sizes = [16, 16, 16], strides = [1, 1, 1]} : vector<16x18x16xbf16> to vector<16x16x16xbf16>
    %17 = vector.extract_strided_slice %7 {offsets = [0, 1, 0], sizes = [16, 16, 16], strides = [1, 1, 1]} : vector<16x18x16xbf16> to vector<16x16x16xbf16>
    %18 = vector.extract_strided_slice %7 {offsets = [0, 2, 0], sizes = [16, 16, 16], strides = [1, 1, 1]} : vector<16x18x16xbf16> to vector<16x16x16xbf16>
    %19 = tpu.concatenate %16, %17, %18 in 2 : vector<16x16x16xbf16>, vector<16x16x16xbf16>, vector<16x16x16xbf16> -> vector<16x16x48xbf16>
    %20 = vector.shape_cast %11 : vector<16x16x48xbf16> to vector<256x48xbf16>
    %c0_2 = arith.constant 0 : index
    %c0_3 = arith.constant 0 : index
    %c0_4 = arith.constant 0 : index
    %21 = vector.load %arg3[%c0_2, %c0_3, %c0_4] : memref<3x48x16xbf16, #tpu.memory_space<vmem>>, vector<1x48x16xbf16>
    %22 = vector.shape_cast %21 : vector<1x48x16xbf16> to vector<48x16xbf16>
    %cst = arith.constant dense<0.000000e+00> : vector<256x16xf32>
    %23 = tpu.matmul %20, %22, %cst {dimension_numbers = #tpu.dot_dimension_numbers<[1], [0], [0], [1], [0, 0, 1, 1], [], []>} : vector<256x48xbf16>, vector<48x16xbf16>, vector<256x16xf32> -> vector<256x16xf32>
    %24 = vector.shape_cast %15 : vector<16x16x48xbf16> to vector<256x48xbf16>
    %c1 = arith.constant 1 : index
    %c0_5 = arith.constant 0 : index
    %c0_6 = arith.constant 0 : index
    %25 = vector.load %arg3[%c1, %c0_5, %c0_6] : memref<3x48x16xbf16, #tpu.memory_space<vmem>>, vector<1x48x16xbf16>
    %26 = vector.shape_cast %25 : vector<1x48x16xbf16> to vector<48x16xbf16>
    %cst_7 = arith.constant dense<0.000000e+00> : vector<256x16xf32>
    %27 = tpu.matmul %24, %26, %cst_7 {dimension_numbers = #tpu.dot_dimension_numbers<[1], [0], [0], [1], [0, 0, 1, 1], [], []>} : vector<256x48xbf16>, vector<48x16xbf16>, vector<256x16xf32> -> vector<256x16xf32>
    %28 = arith.addf %23, %27 : vector<256x16xf32>
    %29 = vector.shape_cast %19 : vector<16x16x48xbf16> to vector<256x48xbf16>
    %c2 = arith.constant 2 : index
    %c0_8 = arith.constant 0 : index
    %c0_9 = arith.constant 0 : index
    %30 = vector.load %arg3[%c2, %c0_8, %c0_9] : memref<3x48x16xbf16, #tpu.memory_space<vmem>>, vector<1x48x16xbf16>
    %31 = vector.shape_cast %30 : vector<1x48x16xbf16> to vector<48x16xbf16>
    %cst_10 = arith.constant dense<0.000000e+00> : vector<256x16xf32>
    %32 = tpu.matmul %29, %31, %cst_10 {dimension_numbers = #tpu.dot_dimension_numbers<[1], [0], [0], [1], [0, 0, 1, 1], [], []>} : vector<256x48xbf16>, vector<48x16xbf16>, vector<256x16xf32> -> vector<256x16xf32>
    %33 = arith.addf %28, %32 : vector<256x16xf32>
    %c0_11 = arith.constant 0 : index
    %c0_12 = arith.constant 0 : index
    %34 = vector.load %arg4[%c0_11, %c0_12] : memref<1x16xf32, #tpu.memory_space<vmem>>, vector<1x16xf32>
    %35 = vector.broadcast %34 : vector<1x16xf32> to vector<256x16xf32>
    %36 = arith.mulf %33, %35 : vector<256x16xf32>
    %c0_13 = arith.constant 0 : index
    %c0_14 = arith.constant 0 : index
    %37 = vector.load %arg5[%c0_13, %c0_14] : memref<1x16xf32, #tpu.memory_space<vmem>>, vector<1x16xf32>
    %38 = vector.broadcast %37 : vector<1x16xf32> to vector<256x16xf32>
    %39 = arith.addf %36, %38 : vector<256x16xf32>
    %cst_15 = arith.constant 0.000000e+00 : f32
    %40 = vector.broadcast %cst_15 : f32 to vector<256x16xf32>
    %41 = arith.maximumf %39, %40 : vector<256x16xf32>
    %42 = vector.shape_cast %41 : vector<256x16xf32> to vector<16x16x16xf32>
    %43 = arith.truncf %42 : vector<16x16x16xf32> to vector<16x16x16xbf16>
    %c0_16 = arith.constant 0 : index
    %c0_17 = arith.constant 0 : index
    %c0_18 = arith.constant 0 : index
    %c0_19 = arith.constant 0 : index
    %44 = vector.load %arg6[%c0_16, %c0_17, %c0_18, %c0_19] : memref<1x16x16x16xbf16, #tpu.memory_space<vmem>>, vector<1x16x16x16xbf16>
    %45 = vector.shape_cast %44 : vector<1x16x16x16xbf16> to vector<16x16x16xbf16>
    %46 = vector.shape_cast %43 : vector<16x16x16xbf16> to vector<1x16x16x16xbf16>
    tpu.vector_store %arg6[%c0_16, %c0_17, %c0_18, %c0_19], %46 {strides = array<i32>} : memref<1x16x16x16xbf16, #tpu.memory_space<vmem>>, vector<1x16x16x16xbf16>,
    return
  }
  func.func @transform_0(%arg0: i32, %arg1: i32) -> (i32, i32, i32, i32) {
    %c0_i32 = arith.constant 0 : i32
    %c0_i32_0 = arith.constant 0 : i32
    %c0_i32_1 = arith.constant 0 : i32
    %c0_i32_2 = arith.constant 0 : i32
    return %arg0, %c0_i32, %c0_i32_0, %c0_i32_1 : i32, i32, i32, i32
  }
  func.func @transform_1(%arg0: i32, %arg1: i32) -> (i32, i32, i32) {
    %c0_i32 = arith.constant 0 : i32
    %c0_i32_0 = arith.constant 0 : i32
    %c0_i32_1 = arith.constant 0 : i32
    %c0_i32_2 = arith.constant 0 : i32
    return %c0_i32, %c0_i32_0, %c0_i32_1 : i32, i32, i32
  }
  func.func @transform_2(%arg0: i32, %arg1: i32) -> (i32, i32) {
    %c0_i32 = arith.constant 0 : i32
    %c0_i32_0 = arith.constant 0 : i32
    %c0_i32_1 = arith.constant 0 : i32
    return %c0_i32, %c0_i32_0 : i32, i32
  }
  func.func @transform_3(%arg0: i32, %arg1: i32) -> (i32, i32) {
    %c0_i32 = arith.constant 0 : i32
    %c0_i32_0 = arith.constant 0 : i32
    %c0_i32_1 = arith.constant 0 : i32
    return %c0_i32, %c0_i32_0 : i32, i32
  }
  func.func @transform_4(%arg0: i32, %arg1: i32) -> (i32, i32, i32, i32) {
    %c0_i32 = arith.constant 0 : i32
    %c0_i32_0 = arith.constant 0 : i32
    %c0_i32_1 = arith.constant 0 : i32
    return %arg0, %arg1, %c0_i32, %c0_i32_0 : i32, i32, i32, i32
  }
}

module attributes {stable_mosaic.version = 11 : i64} {
  func.func @_pw_conv_res_kernel(%arg0: i32, %arg1: memref<256x16xbf16, #tpu.memory_space<vmem>>, %arg2: memref<16x64xbf16, #tpu.memory_space<vmem>>, %arg3: memref<1x64xf32, #tpu.memory_space<vmem>>, %arg4: memref<1x64xf32, #tpu.memory_space<vmem>>, %arg5: memref<256x64xf32, #tpu.memory_space<vmem>>, %arg6: memref<256x64xf32, #tpu.memory_space<vmem>>) attributes {dimension_semantics = [#tpu.dimension_semantics<parallel>], iteration_bounds = array<i64: 2>, scalar_prefetch = 0 : i64, scratch_operands = 0 : i64, tpu.core_type = #tpu.core_type<tc>, window_params = [{transform_indices = @transform_0, window_bounds = array<i64: 256, 16>}, {pipeline_mode = #tpu.pipeline_mode<synchronous>, transform_indices = @transform_1, window_bounds = array<i64: 16, 64>}, {pipeline_mode = #tpu.pipeline_mode<synchronous>, transform_indices = @transform_2, window_bounds = array<i64: 1, 64>}, {pipeline_mode = #tpu.pipeline_mode<synchronous>, transform_indices = @transform_3, window_bounds = array<i64: 1, 64>}, {transform_indices = @transform_4, window_bounds = array<i64: 256, 64>}, {transform_indices = @transform_5, window_bounds = array<i64: 256, 64>}]} {
    %c0 = arith.constant 0 : index
    %c0_0 = arith.constant 0 : index
    %0 = vector.load %arg1[%c0, %c0_0] : memref<256x16xbf16, #tpu.memory_space<vmem>>, vector<256x16xbf16>
    %c0_1 = arith.constant 0 : index
    %c0_2 = arith.constant 0 : index
    %1 = vector.load %arg2[%c0_1, %c0_2] : memref<16x64xbf16, #tpu.memory_space<vmem>>, vector<16x64xbf16>
    %cst = arith.constant dense<0.000000e+00> : vector<256x64xf32>
    %2 = tpu.matmul %0, %1, %cst {dimension_numbers = #tpu.dot_dimension_numbers<[1], [0], [0], [1], [0, 0, 1, 1], [], []>} : vector<256x16xbf16>, vector<16x64xbf16>, vector<256x64xf32> -> vector<256x64xf32>
    %c0_3 = arith.constant 0 : index
    %c0_4 = arith.constant 0 : index
    %3 = vector.load %arg3[%c0_3, %c0_4] : memref<1x64xf32, #tpu.memory_space<vmem>>, vector<1x64xf32>
    %4 = vector.broadcast %3 : vector<1x64xf32> to vector<256x64xf32>
    %5 = arith.mulf %2, %4 : vector<256x64xf32>
    %c0_5 = arith.constant 0 : index
    %c0_6 = arith.constant 0 : index
    %6 = vector.load %arg4[%c0_5, %c0_6] : memref<1x64xf32, #tpu.memory_space<vmem>>, vector<1x64xf32>
    %7 = vector.broadcast %6 : vector<1x64xf32> to vector<256x64xf32>
    %8 = arith.addf %5, %7 : vector<256x64xf32>
    %c0_7 = arith.constant 0 : index
    %c0_8 = arith.constant 0 : index
    %9 = vector.load %arg5[%c0_7, %c0_8] : memref<256x64xf32, #tpu.memory_space<vmem>>, vector<256x64xf32>
    %10 = arith.addf %8, %9 : vector<256x64xf32>
    %cst_9 = arith.constant 0.000000e+00 : f32
    %11 = vector.broadcast %cst_9 : f32 to vector<256x64xf32>
    %12 = arith.maximumf %10, %11 : vector<256x64xf32>
    %c0_10 = arith.constant 0 : index
    %c0_11 = arith.constant 0 : index
    %13 = vector.load %arg6[%c0_10, %c0_11] : memref<256x64xf32, #tpu.memory_space<vmem>>, vector<256x64xf32>
    tpu.vector_store %arg6[%c0_10, %c0_11], %12 {strides = array<i32>} : memref<256x64xf32, #tpu.memory_space<vmem>>, vector<256x64xf32>,
    return
  }
  func.func @transform_0(%arg0: i32) -> (i32, i32) {
    %c0_i32 = arith.constant 0 : i32
    %c0_i32_0 = arith.constant 0 : i32
    return %arg0, %c0_i32 : i32, i32
  }
  func.func @transform_1(%arg0: i32) -> (i32, i32) {
    %c0_i32 = arith.constant 0 : i32
    %c0_i32_0 = arith.constant 0 : i32
    %c0_i32_1 = arith.constant 0 : i32
    return %c0_i32, %c0_i32_0 : i32, i32
  }
  func.func @transform_2(%arg0: i32) -> (i32, i32) {
    %c0_i32 = arith.constant 0 : i32
    %c0_i32_0 = arith.constant 0 : i32
    %c0_i32_1 = arith.constant 0 : i32
    return %c0_i32, %c0_i32_0 : i32, i32
  }
  func.func @transform_3(%arg0: i32) -> (i32, i32) {
    %c0_i32 = arith.constant 0 : i32
    %c0_i32_0 = arith.constant 0 : i32
    %c0_i32_1 = arith.constant 0 : i32
    return %c0_i32, %c0_i32_0 : i32, i32
  }
  func.func @transform_4(%arg0: i32) -> (i32, i32) {
    %c0_i32 = arith.constant 0 : i32
    %c0_i32_0 = arith.constant 0 : i32
    return %arg0, %c0_i32 : i32, i32
  }
  func.func @transform_5(%arg0: i32) -> (i32, i32) {
    %c0_i32 = arith.constant 0 : i32
    %c0_i32_0 = arith.constant 0 : i32
    return %arg0, %c0_i32 : i32, i32
  }
}

</mosaic_0001>

<bundles_post_ra>
// kernel: bottleneck_forward.3
= control target key start
LH: loop header
LB: loop body
LE: loop exit
PB: predicated region body
PF: predicated region fallthrough
CT: control target
= control target key end

     0   :  { %9 = vsyncpa [#allocation3], 0  ;;  %s1168_s0 = inlined_call_operand.hbm [shape: f32[512,64], index: 0, kind: input, shape index: {}]   ;;  %s1169_s1 = inlined_call_operand.vmem [shape: bf16[64,16], index: 1, kind: input, shape index: {}]   ;;  %s1170_s2 = inlined_call_operand.vmem [shape: f32[1,16], index: 2, kind: input, shape index: {}]   ;;  %s1171_s3 = inlined_call_operand.vmem [shape: f32[1,16], index: 3, kind: input, shape index: {}]   ;;  %s1172_s4 = inlined_call_operand.vmem [shape: bf16[512,16], index: 4, kind: output, shape index: {}]  }
   0x1   :  { %11 = vsyncpa [#allocation3 + $0x1], 0  ;;  %s875_s15 = smov 0   ;;  %s877_s16 = smov 0  }
   0x2   :  { %s879_s17 = smov 0   ;;  %s881_s18 = smov 0  }
   0x3 LB: > { %s677_s19 = sadd.s32 4294967295, %s846_s18   ;;  %s895_s20 = sadd.s32 1, %s846_s18   ;;  %s846_s18 = sphi %s881_s18, %s1179_s18   ;;  %s842_s17 = sphi %s879_s17, %s1178_s17   ;;  %s838_s16 = sphi %s877_s16, %s1177_s16   ;;  %s834_s15 = sphi %s875_s15, %s1176_s15  }
   0x4   : > { %s21_s21 = ssub.s32 %s846_s18, %s895_s20  ;;  %s24_s22 = sadd.s32 1, %s842_s17 }
   0x5   : > { %p22_p0 = scmp.eq.s32.totalorder %s21_s21, 0  ;;  %p31_p1 = scmp.ne.s32.totalorder %s842_s17, %s838_s16 }
   0x6   : > { %p32_p2 = scmp.eq.s32.totalorder %s846_s18, 0  ;;  %p37_p3 = scmp.ne.s32.totalorder %s838_s16, %s834_s15 }
   0x7   : > { %s905_s23 = scalar_select %p22_p0, %s842_s17, %s24_s22  }
   0x8   : > { %p907_p4 = por %p32_p2, %p31_p1  ;;  %p38_p5 = scmp.eq.s32.totalorder %s677_s19, 0 }
   0x9   : > { %p745_p6 = scmp.lt.s32.totalorder %s846_s18, 2  ;;  %s159_s26 = sand.u32 1, %s842_s17  }
   0xa   : > { %p914_p7 = por %p38_p5, %p37_p3  ;;  %s681_s27 = sshll.u32 %s159_s26, 8 }
   0xb   : > { %s722_s28 = sshll.u32 %s846_s18, 8  ;;  %s163_s6 = scalar_lea.vmem [#allocation2], %s681_s27 }
   0xc   : > { %s168_s5 = scalar_lea.hbm %s1168_s0, %s722_s28  ;;  %s171_s7 = sshll.u32 %s163_s6, 4  ;;  %s172_s7 = int_to_ptr.vmem [resolvable:$true] %s171_s7 }
   0xd   : > { %s169_s8 = sshll.u32 %s168_s5, 4  ;;  %p925_p8 = pnand %p745_p6, %p907_p4  ;;  %s170_s8 = int_to_ptr.hbm [resolvable:$true] %s169_s8 }
   0xe   : > { %p684_p9 = scmp.ge.s32.totalorder %s846_s18, 1  ;;  %s160_s10 = scalar_lea.sflag [#allocation3], %s159_s26 }
   0xf   : > { %s782_s11 = sshra.s32 %s170_s8, 4  ;;  %p786_p11 = pneg %p925_p8  ;;  %s783_s11 = int_to_ptr.hbm [resolvable:$true] %s782_s11 }
  0x10   : > { %s784_s12 = scalar_lea.hbm %s783_s11, 256  ;;  %s789_s15 = scalar_lea.hbm %s1168_s0, 512 }
  0x11   : > { %p785_p10 = scmp.ne.s32.totalorder %s783_s11, %s784_s12  ;;  %p790_p0 = scmp.lt.s32.totalorder %s783_s11, %s1168_s0 }
  0x12   : > { %p791_p1 = scmp.lt.s32.totalorder %s789_s15, %s784_s12 }
  0x13   : > { %p787_p12 = pnand %p786_p11, %p785_p10 }
  0x14   : > { %p792_p2 = por %p791_p1, %p790_p0 }
  0x15   : > { %p788_p13 = pneg %p787_p12 }
  0x17   : > { %p793_p3 = pnand %p792_p2, %p788_p13 }
  0x19   : > { %796 = shalt.err (!%p793_p3)
}
  0x1a   : > { %s848_s24 = smov 128   ;;  %s849_s26 = smov 8  }
  0x1b   : > { %744 = dma.hbm_to_vmem [thread:$0]  (!%p925_p8), %s170_s8, 4096, %s172_s7, %s160_s10, %s848_s24, %s848_s24, %s849_s26  }
  0x1c   : > { %p179_p4 = scmp.lt.s32.totalorder %s846_s18, 3 }
  0x1e   : > { %p180_p5 = pnand %p684_p9, %p179_p4 }
  0x1f   : > { %s185_s27 = sand.u32 (!%p180_p5), 1, %s838_s16  }
  0x20   : > { %183 = sbr.rel (%p180_p5) target bundleno = 253 (0xfd), region = 36  ;;  %s685_s28 = sshll.u32 (!%p180_p5), %s185_s27, 8 }
  0x21   : > { %s186_s29 = scalar_lea.sflag (!%p180_p5), [#allocation3], %s185_s27  ;;  %s944_s30 = scalar_lea.vmem (!%p180_p5), [#allocation2], %s685_s28 }
  0x25   : > { %829 = dma.done.wait (%p914_p7), %s186_s29, 4096  }
  0x26   : > { %831 = vsyncadd (%p914_p7), %s186_s29, 4294963200  ;;  %v726_v0 = vld [vmem:[%s1169_s1 + $0x18] sm:$0xff]  ;;  %v725_v1 = vld [vmem:[%s1169_s1 + $0x10] sm:$0xff]  ;;  %vm303_vm0 = vcmask 523264   ;;  %s686_s12 = sshll.u32 %s677_s19, 5  ;;  %vm577_vm1 = vcmask 125952  }
  0x27   : > { %356 = vmatpush.bf16.msra.mxu0 %v726_v0  ;;  %727 = vmatpush.bf16.msra.mxu1 %v726_v0  ;;  %v724_v2 = vld [vmem:[%s1169_s1 + $0x8] sm:$0xff]  ;;  %v723_v3 = vld [vmem:[%s1169_s1] sm:$0xff]  ;;  %v225_v16 = vld [vmem:[%s944_s30 + $0x10] sm:$0xff]  ;;  %p217_p6 = scmp.lt.s32.totalorder %s686_s12, 63 }
  0x28   : > { %728 = vmatpush.bf16.msra.mxu2 %v726_v0  ;;  %729 = vmatpush.bf16.msra.mxu3 %v726_v0  ;;  %v223_v4 = vld [vmem:[%s944_s30] sm:$0xff]  ;;  %v224_v5 = vld [vmem:[%s944_s30 + $0x8] sm:$0xff]  ;;  %v226_v17 = vld [vmem:[%s944_s30 + $0x18] sm:$0xff] }
  0x29   : > { %v231_v6 = vld [vmem:[%s944_s30 + $0x40] sm:$0xff]  ;;  %v232_v7 = vld [vmem:[%s944_s30 + $0x48] sm:$0xff]  ;;  %v255_v12 = vpack.c.bf16 %v224_v5, %v223_v4  ;;  %v233_v18 = vld [vmem:[%s944_s30 + $0x50] sm:$0xff]  ;;  %v256_v24 = vpack.c.bf16 %v226_v17, %v225_v16  ;;  %s1181_s12 = smov (!%p217_p6, %s686_s12), 63 }
  0x2a   : > { %v239_v8 = vld [vmem:[%s944_s30 + $0x80] sm:$0xff]  ;;  %v240_v9 = vld [vmem:[%s944_s30 + $0x88] sm:$0xff]  ;;  %v259_v13 = vpack.c.bf16 %v232_v7, %v231_v6  ;;  %v234_v19 = vld [vmem:[%s944_s30 + $0x58] sm:$0xff]  ;;  %s687_s18 = sshll.u32 %s1181_s12, 2 }
  0x2b   : > { %357 = vmatpush.bf16.msra.mxu0 %v725_v1  ;;  %730 = vmatpush.bf16.msra.mxu1 %v725_v1  ;;  %v247_v10 = vld [vmem:[%s944_s30 + $0xc0] sm:$0xff]  ;;  %v248_v11 = vld [vmem:[%s944_s30 + $0xc8] sm:$0xff]  ;;  %v263_v14 = vpack.c.bf16 %v240_v9, %v239_v8  ;;  %v241_v20 = vld [vmem:[%s944_s30 + $0x90] sm:$0xff]  ;;  %v260_v25 = vpack.c.bf16 %v234_v19, %v233_v18  ;;  %s1029_s24 = scalar_lea.vmem %s1172_s4, %s687_s18 }
  0x2c   : > { %731 = vmatpush.bf16.msra.mxu2 %v725_v1  ;;  %732 = vmatpush.bf16.msra.mxu3 %v725_v1  ;;  %v267_v15 = vpack.c.bf16 %v248_v11, %v247_v10  ;;  %v242_v21 = vld [vmem:[%s944_s30 + $0x98] sm:$0xff]  ;;  %v249_v22 = vld [vmem:[%s944_s30 + $0xd0] sm:$0xff]  ;;  %v227_v28 = vld [vmem:[%s944_s30 + $0x20] sm:$0xff] }
  0x2d   : > { %v250_v23 = vld [vmem:[%s944_s30 + $0xd8] sm:$0xff]  ;;  %v264_v26 = vpack.c.bf16 %v242_v21, %v241_v20  ;;  %v228_v29 = vld [vmem:[%s944_s30 + $0x28] sm:$0xff]  ;;  %v235_v30 = vld [vmem:[%s944_s30 + $0x60] sm:$0xff] }
  0x2e   : > { %v268_v27 = vpack.c.bf16 %v250_v23, %v249_v22  ;;  %v236_v31 = vld [vmem:[%s944_s30 + $0x68] sm:$0xff]  ;;  %v243_v32 = vld [vmem:[%s944_s30 + $0xa0] sm:$0xff]  ;;  %v257_v36 = vpack.c.bf16 %v228_v29, %v227_v28  ;;  %v229_v40 = vld [vmem:[%s944_s30 + $0x30] sm:$0xff] }
  0x2f   : > { %358 = vmatpush.bf16.msra.mxu0 %v724_v2  ;;  %733 = vmatpush.bf16.msra.mxu1 %v724_v2  ;;  %v244_v33 = vld [vmem:[%s944_s30 + $0xa8] sm:$0xff]  ;;  %v251_v34 = vld [vmem:[%s944_s30 + $0xe0] sm:$0xff]  ;;  %v261_v37 = vpack.c.bf16 %v236_v31, %v235_v30  ;;  %v230_v41 = vld [vmem:[%s944_s30 + $0x38] sm:$0xff] }
  0x30   : > { %734 = vmatpush.bf16.msra.mxu2 %v724_v2  ;;  %735 = vmatpush.bf16.msra.mxu3 %v724_v2  ;;  %v252_v35 = vld [vmem:[%s944_s30 + $0xe8] sm:$0xff]  ;;  %v265_v38 = vpack.c.bf16 %v244_v33, %v243_v32  ;;  %v237_v42 = vld [vmem:[%s944_s30 + $0x70] sm:$0xff]  ;;  %v238_v43 = vld [vmem:[%s944_s30 + $0x78] sm:$0xff]  ;;  %v258_v48 = vpack.c.bf16 %v230_v41, %v229_v40 }
  0x31   : > { %v269_v39 = vpack.c.bf16 %v252_v35, %v251_v34  ;;  %v245_v44 = vld [vmem:[%s944_s30 + $0xb0] sm:$0xff]  ;;  %v246_v45 = vld [vmem:[%s944_s30 + $0xb8] sm:$0xff]  ;;  %v262_v49 = vpack.c.bf16 %v238_v43, %v237_v42  ;;  %v1015_v52 = vld [vmem:[%s1170_s2] ss:$0 sm:$0xff] }
  0x32   : > { %v253_v46 = vld [vmem:[%s944_s30 + $0xf0] sm:$0xff]  ;;  %v254_v47 = vld [vmem:[%s944_s30 + $0xf8] sm:$0xff]  ;;  %v266_v50 = vpack.c.bf16 %v246_v45, %v245_v44  ;;  %v1020_v53 = vld [vmem:[%s1171_s3] ss:$0 sm:$0xff] }
  0x33   : > { %359 = vmatpush.bf16.msra.mxu0 %v723_v3  ;;  %736 = vmatpush.bf16.msra.mxu1 %v723_v3  ;;  %v270_v51 = vpack.c.bf16 %v254_v47, %v253_v46 }
  0x34   : > { %737 = vmatpush.bf16.msra.mxu2 %v723_v3  ;;  %738 = vmatpush.bf16.msra.mxu3 %v723_v3 }
  0x36   : > { %704 = vmatmul.msk.bf16.vlgmr.msra.gmra.mxu0 %vm303_vm0, %v255_v12  ;;  %708 = vmatmul.msk.bf16.vlgmr.msra.gmra.mxu1 %vm303_vm0, %v259_v13 }
  0x37   : > { %712 = vmatmul.msk.bf16.vlgmr.msra.gmra.mxu2 %vm303_vm0, %v263_v14  ;;  %716 = vmatmul.msk.bf16.vlgmr.msra.gmra.mxu3 %vm303_vm0, %v267_v15 }
  0x46   : > { %705 = vmatmul.msk.bf16.gmra.mxu0 %vm303_vm0, %v256_v24  ;;  %709 = vmatmul.msk.bf16.gmra.mxu1 %vm303_vm0, %v260_v25 }
  0x47   : > { %713 = vmatmul.msk.bf16.gmra.mxu2 %vm303_vm0, %v264_v26  ;;  %717 = vmatmul.msk.bf16.gmra.mxu3 %vm303_vm0, %v268_v27 }
  0x56   : > { %706 = vmatmul.msk.bf16.gmra.mxu0 %vm303_vm0, %v257_v36  ;;  %710 = vmatmul.msk.bf16.gmra.mxu1 %vm303_vm0, %v261_v37 }
  0x57   : > { %714 = vmatmul.msk.bf16.gmra.mxu2 %vm303_vm0, %v265_v38  ;;  %718 = vmatmul.msk.bf16.gmra.mxu3 %vm303_vm0, %v269_v39 }
  0x66   : > { %707 = vmatmul.msk.bf16.gmra.mxu0 %vm303_vm0, %v258_v48  ;;  %711 = vmatmul.msk.bf16.gmra.mxu1 %vm303_vm0, %v262_v49 }
  0x67   : > { %715 = vmatmul.msk.bf16.gmra.mxu2 %vm303_vm0, %v266_v50  ;;  %719 = vmatmul.msk.bf16.gmra.mxu3 %vm303_vm0, %v270_v51 }
  0xb3   : > { %v361_v54 = vpop.f32.mrf.mxu0  ;;  %v381_v55 = vpop.f32.mrf.mxu1 }
  0xb4   : > { %v445_v56 = vmul.f32 %v1015_v52, %v361_v54  ;;  %v453_v57 = vmul.f32 %v1015_v52, %v381_v55 }
  0xb6   : > { %v481_v58 = vadd.f32 %v1020_v53, %v445_v56  ;;  %v489_v59 = vadd.f32 %v1020_v53, %v453_v57 }
  0xb8   : > { %v513_v60 = vmax.f32 %v481_v58, 0.0  ;;  %v521_v61 = vmax.f32 %v489_v59, 0.0 }
  0xba   : > { %v545_v62 = vpack.c.bf16 %v513_v60, %v513_v60  ;;  %v553_v63 = vpack.c.bf16 %v521_v61, %v521_v61  ;;  %v401_v0 = vpop.f32.mrf.mxu2  ;;  %v421_v1 = vpop.f32.mrf.mxu3 }
  0xbb   : > { %v461_v2 = vmul.f32 %v1015_v52, %v401_v0  ;;  %v469_v3 = vmul.f32 %v1015_v52, %v421_v1  ;;  %v363_v4 = vpop.f32.mrf.mxu0  ;;  %v383_v5 = vpop.f32.mrf.mxu1 }
  0xbc   : > { %578 = vst.msk [vmem:[%s1029_s24] sm:$0xf] %vm577_vm1, %v545_v62  ;;  %v446_v6 = vmul.f32 %v1015_v52, %v363_v4  ;;  %v454_v7 = vmul.f32 %v1015_v52, %v383_v5 }
  0xbd   : > { %586 = vst.msk [vmem:[%s1029_s24 + $0x20] sm:$0xf] %vm577_vm1, %v553_v63  ;;  %v497_v8 = vadd.f32 %v1020_v53, %v461_v2  ;;  %v505_v9 = vadd.f32 %v1020_v53, %v469_v3 }
  0xbe   : > { %v482_v10 = vadd.f32 %v1020_v53, %v446_v6  ;;  %v490_v11 = vadd.f32 %v1020_v53, %v454_v7 }
  0xbf   : > { %v529_v12 = vmax.f32 %v497_v8, 0.0  ;;  %v537_v13 = vmax.f32 %v505_v9, 0.0 }
  0xc0   : > { %v514_v14 = vmax.f32 %v482_v10, 0.0  ;;  %v522_v15 = vmax.f32 %v490_v11, 0.0 }
  0xc1   : > { %v561_v16 = vpack.c.bf16 %v529_v12, %v529_v12  ;;  %v569_v17 = vpack.c.bf16 %v537_v13, %v537_v13 }
  0xc2   : > { %v546_v18 = vpack.c.bf16 %v514_v14, %v514_v14  ;;  %v554_v19 = vpack.c.bf16 %v522_v15, %v522_v15  ;;  %v403_v20 = vpop.f32.mrf.mxu2  ;;  %v423_v21 = vpop.f32.mrf.mxu3 }
  0xc3   : > { %594 = vst.msk [vmem:[%s1029_s24 + $0x40] sm:$0xf] %vm577_vm1, %v561_v16  ;;  %v462_v22 = vmul.f32 %v1015_v52, %v403_v20  ;;  %v470_v23 = vmul.f32 %v1015_v52, %v423_v21  ;;  %v366_v24 = vpop.f32.mrf.mxu0  ;;  %v386_v25 = vpop.f32.mrf.mxu1 }
  0xc4   : > { %602 = vst.msk [vmem:[%s1029_s24 + $0x60] sm:$0xf] %vm577_vm1, %v569_v17  ;;  %v447_v26 = vmul.f32 %v1015_v52, %v366_v24  ;;  %v455_v27 = vmul.f32 %v1015_v52, %v386_v25 }
  0xc5   : > { %579 = vst.msk [vmem:[%s1029_s24 + $0x4] sm:$0xf] %vm577_vm1, %v546_v18  ;;  %v498_v28 = vadd.f32 %v1020_v53, %v462_v22  ;;  %v506_v29 = vadd.f32 %v1020_v53, %v470_v23 }
  0xc6   : > { %587 = vst.msk [vmem:[%s1029_s24 + $0x24] sm:$0xf] %vm577_vm1, %v554_v19  ;;  %v483_v30 = vadd.f32 %v1020_v53, %v447_v26  ;;  %v491_v31 = vadd.f32 %v1020_v53, %v455_v27 }
  0xc7   : > { %v530_v32 = vmax.f32 %v498_v28, 0.0  ;;  %v538_v33 = vmax.f32 %v506_v29, 0.0 }
  0xc8   : > { %v515_v34 = vmax.f32 %v483_v30, 0.0  ;;  %v523_v35 = vmax.f32 %v491_v31, 0.0 }
  0xc9   : > { %v562_v36 = vpack.c.bf16 %v530_v32, %v530_v32  ;;  %v570_v37 = vpack.c.bf16 %v538_v33, %v538_v33 }
  0xca   : > { %v547_v38 = vpack.c.bf16 %v515_v34, %v515_v34  ;;  %v555_v39 = vpack.c.bf16 %v523_v35, %v523_v35  ;;  %v406_v40 = vpop.f32.mrf.mxu2  ;;  %v426_v41 = vpop.f32.mrf.mxu3 }
  0xcb   : > { %595 = vst.msk [vmem:[%s1029_s24 + $0x44] sm:$0xf] %vm577_vm1, %v562_v36  ;;  %v463_v42 = vmul.f32 %v1015_v52, %v406_v40  ;;  %v471_v43 = vmul.f32 %v1015_v52, %v426_v41  ;;  %v368_v44 = vpop.f32.mrf.mxu0  ;;  %v388_v45 = vpop.f32.mrf.mxu1 }
  0xcc   : > { %603 = vst.msk [vmem:[%s1029_s24 + $0x64] sm:$0xf] %vm577_vm1, %v570_v37  ;;  %v448_v46 = vmul.f32 %v1015_v52, %v368_v44  ;;  %v456_v47 = vmul.f32 %v1015_v52, %v388_v45 }
  0xcd   : > { %580 = vst.msk [vmem:[%s1029_s24 + $0x8] sm:$0xf] %vm577_vm1, %v547_v38  ;;  %v499_v48 = vadd.f32 %v1020_v53, %v463_v42  ;;  %v507_v49 = vadd.f32 %v1020_v53, %v471_v43 }
  0xce   : > { %588 = vst.msk [vmem:[%s1029_s24 + $0x28] sm:$0xf] %vm577_vm1, %v555_v39  ;;  %v484_v50 = vadd.f32 %v1020_v53, %v448_v46  ;;  %v492_v51 = vadd.f32 %v1020_v53, %v456_v47 }
  0xcf   : > { %v531_v54 = vmax.f32 %v499_v48, 0.0  ;;  %v539_v55 = vmax.f32 %v507_v49, 0.0 }
  0xd0   : > { %v516_v56 = vmax.f32 %v484_v50, 0.0  ;;  %v524_v57 = vmax.f32 %v492_v51, 0.0 }
  0xd1   : > { %v563_v58 = vpack.c.bf16 %v531_v54, %v531_v54  ;;  %v571_v59 = vpack.c.bf16 %v539_v55, %v539_v55 }
  0xd2   : > { %v548_v60 = vpack.c.bf16 %v516_v56, %v516_v56  ;;  %v556_v61 = vpack.c.bf16 %v524_v57, %v524_v57  ;;  %v408_v62 = vpop.f32.mrf.mxu2  ;;  %v428_v63 = vpop.f32.mrf.mxu3 }
  0xd3   : > { %596 = vst.msk [vmem:[%s1029_s24 + $0x48] sm:$0xf] %vm577_vm1, %v563_v58  ;;  %v464_v0 = vmul.f32 %v1015_v52, %v408_v62  ;;  %v472_v1 = vmul.f32 %v1015_v52, %v428_v63  ;;  %v371_v2 = vpop.f32.mrf.mxu0  ;;  %v391_v3 = vpop.f32.mrf.mxu1 }
  0xd4   : > { %604 = vst.msk [vmem:[%s1029_s24 + $0x68] sm:$0xf] %vm577_vm1, %v571_v59  ;;  %v449_v4 = vmul.f32 %v1015_v52, %v371_v2  ;;  %v457_v5 = vmul.f32 %v1015_v52, %v391_v3 }
  0xd5   : > { %581 = vst.msk [vmem:[%s1029_s24 + $0xc] sm:$0xf] %vm577_vm1, %v548_v60  ;;  %v500_v6 = vadd.f32 %v1020_v53, %v464_v0  ;;  %v508_v7 = vadd.f32 %v1020_v53, %v472_v1 }
  0xd6   : > { %589 = vst.msk [vmem:[%s1029_s24 + $0x2c] sm:$0xf] %vm577_vm1, %v556_v61  ;;  %v485_v8 = vadd.f32 %v1020_v53, %v449_v4  ;;  %v493_v9 = vadd.f32 %v1020_v53, %v457_v5 }
  0xd7   : > { %v532_v10 = vmax.f32 %v500_v6, 0.0  ;;  %v540_v11 = vmax.f32 %v508_v7, 0.0 }
  0xd8   : > { %v517_v12 = vmax.f32 %v485_v8, 0.0  ;;  %v525_v13 = vmax.f32 %v493_v9, 0.0 }
  0xd9   : > { %v564_v14 = vpack.c.bf16 %v532_v10, %v532_v10  ;;  %v572_v15 = vpack.c.bf16 %v540_v11, %v540_v11 }
  0xda   : > { %v549_v16 = vpack.c.bf16 %v517_v12, %v517_v12  ;;  %v557_v17 = vpack.c.bf16 %v525_v13, %v525_v13  ;;  %v411_v18 = vpop.f32.mrf.mxu2  ;;  %v431_v19 = vpop.f32.mrf.mxu3 }
  0xdb   : > { %597 = vst.msk [vmem:[%s1029_s24 + $0x4c] sm:$0xf] %vm577_vm1, %v564_v14  ;;  %v465_v20 = vmul.f32 %v1015_v52, %v411_v18  ;;  %v473_v21 = vmul.f32 %v1015_v52, %v431_v19  ;;  %v373_v22 = vpop.f32.mrf.mxu0  ;;  %v393_v23 = vpop.f32.mrf.mxu1 }
  0xdc   : > { %605 = vst.msk [vmem:[%s1029_s24 + $0x6c] sm:$0xf] %vm577_vm1, %v572_v15  ;;  %v450_v24 = vmul.f32 %v1015_v52, %v373_v22  ;;  %v458_v25 = vmul.f32 %v1015_v52, %v393_v23 }
  0xdd   : > { %582 = vst.msk [vmem:[%s1029_s24 + $0x10] sm:$0xf] %vm577_vm1, %v549_v16  ;;  %v501_v26 = vadd.f32 %v1020_v53, %v465_v20  ;;  %v509_v27 = vadd.f32 %v1020_v53, %v473_v21 }
  0xde   : > { %590 = vst.msk [vmem:[%s1029_s24 + $0x30] sm:$0xf] %vm577_vm1, %v557_v17  ;;  %v486_v28 = vadd.f32 %v1020_v53, %v450_v24  ;;  %v494_v29 = vadd.f32 %v1020_v53, %v458_v25 }
  0xdf   : > { %v533_v30 = vmax.f32 %v501_v26, 0.0  ;;  %v541_v31 = vmax.f32 %v509_v27, 0.0 }
  0xe0   : > { %v518_v32 = vmax.f32 %v486_v28, 0.0  ;;  %v526_v33 = vmax.f32 %v494_v29, 0.0 }
  0xe1   : > { %v565_v34 = vpack.c.bf16 %v533_v30, %v533_v30  ;;  %v573_v35 = vpack.c.bf16 %v541_v31, %v541_v31 }
  0xe2   : > { %v550_v36 = vpack.c.bf16 %v518_v32, %v518_v32  ;;  %v558_v37 = vpack.c.bf16 %v526_v33, %v526_v33  ;;  %v413_v38 = vpop.f32.mrf.mxu2  ;;  %v433_v39 = vpop.f32.mrf.mxu3 }
  0xe3   : > { %598 = vst.msk [vmem:[%s1029_s24 + $0x50] sm:$0xf] %vm577_vm1, %v565_v34  ;;  %v466_v40 = vmul.f32 %v1015_v52, %v413_v38  ;;  %v474_v41 = vmul.f32 %v1015_v52, %v433_v39  ;;  %v376_v42 = vpop.f32.mrf.mxu0  ;;  %v396_v43 = vpop.f32.mrf.mxu1 }
  0xe4   : > { %606 = vst.msk [vmem:[%s1029_s24 + $0x70] sm:$0xf] %vm577_vm1, %v573_v35  ;;  %v451_v44 = vmul.f32 %v1015_v52, %v376_v42  ;;  %v459_v45 = vmul.f32 %v1015_v52, %v396_v43 }
  0xe5   : > { %583 = vst.msk [vmem:[%s1029_s24 + $0x14] sm:$0xf] %vm577_vm1, %v550_v36  ;;  %v502_v46 = vadd.f32 %v1020_v53, %v466_v40  ;;  %v510_v47 = vadd.f32 %v1020_v53, %v474_v41 }
  0xe6   : > { %591 = vst.msk [vmem:[%s1029_s24 + $0x34] sm:$0xf] %vm577_vm1, %v558_v37  ;;  %v487_v48 = vadd.f32 %v1020_v53, %v451_v44  ;;  %v495_v49 = vadd.f32 %v1020_v53, %v459_v45 }
  0xe7   : > { %v534_v50 = vmax.f32 %v502_v46, 0.0  ;;  %v542_v51 = vmax.f32 %v510_v47, 0.0 }
  0xe8   : > { %v519_v54 = vmax.f32 %v487_v48, 0.0  ;;  %v527_v55 = vmax.f32 %v495_v49, 0.0 }
  0xe9   : > { %v566_v56 = vpack.c.bf16 %v534_v50, %v534_v50  ;;  %v574_v57 = vpack.c.bf16 %v542_v51, %v542_v51 }
  0xea   : > { %v551_v58 = vpack.c.bf16 %v519_v54, %v519_v54  ;;  %v559_v59 = vpack.c.bf16 %v527_v55, %v527_v55  ;;  %v416_v60 = vpop.f32.mrf.mxu2  ;;  %v436_v61 = vpop.f32.mrf.mxu3 }
  0xeb   : > { %599 = vst.msk [vmem:[%s1029_s24 + $0x54] sm:$0xf] %vm577_vm1, %v566_v56  ;;  %v467_v62 = vmul.f32 %v1015_v52, %v416_v60  ;;  %v475_v63 = vmul.f32 %v1015_v52, %v436_v61  ;;  %v378_v0 = vpop.f32.mrf.mxu0  ;;  %v398_v1 = vpop.f32.mrf.mxu1 }
  0xec   : > { %607 = vst.msk [vmem:[%s1029_s24 + $0x74] sm:$0xf] %vm577_vm1, %v574_v57  ;;  %v452_v2 = vmul.f32 %v1015_v52, %v378_v0  ;;  %v460_v3 = vmul.f32 %v1015_v52, %v398_v1 }
  0xed   : > { %584 = vst.msk [vmem:[%s1029_s24 + $0x18] sm:$0xf] %vm577_vm1, %v551_v58  ;;  %v503_v4 = vadd.f32 %v1020_v53, %v467_v62  ;;  %v511_v5 = vadd.f32 %v1020_v53, %v475_v63 }
  0xee   : > { %592 = vst.msk [vmem:[%s1029_s24 + $0x38] sm:$0xf] %vm577_vm1, %v559_v59  ;;  %v488_v6 = vadd.f32 %v1020_v53, %v452_v2  ;;  %v496_v7 = vadd.f32 %v1020_v53, %v460_v3 }
  0xef   : > { %v535_v8 = vmax.f32 %v503_v4, 0.0  ;;  %v543_v9 = vmax.f32 %v511_v5, 0.0 }
  0xf0   : > { %v520_v10 = vmax.f32 %v488_v6, 0.0  ;;  %v528_v11 = vmax.f32 %v496_v7, 0.0 }
  0xf1   : > { %v567_v12 = vpack.c.bf16 %v535_v8, %v535_v8  ;;  %v575_v13 = vpack.c.bf16 %v543_v9, %v543_v9 }
  0xf2   : > { %v552_v14 = vpack.c.bf16 %v520_v10, %v520_v10  ;;  %v560_v15 = vpack.c.bf16 %v528_v11, %v528_v11  ;;  %v418_v16 = vpop.f32.mrf.mxu2  ;;  %v438_v17 = vpop.f32.mrf.mxu3 }
  0xf3   : > { %600 = vst.msk [vmem:[%s1029_s24 + $0x58] sm:$0xf] %vm577_vm1, %v567_v12  ;;  %v468_v18 = vmul.f32 %v1015_v52, %v418_v16  ;;  %v476_v19 = vmul.f32 %v1015_v52, %v438_v17 }
  0xf4   : > { %608 = vst.msk [vmem:[%s1029_s24 + $0x78] sm:$0xf] %vm577_vm1, %v575_v13 }
  0xf5   : > { %585 = vst.msk [vmem:[%s1029_s24 + $0x1c] sm:$0xf] %vm577_vm1, %v552_v14  ;;  %v504_v20 = vadd.f32 %v1020_v53, %v468_v18  ;;  %v512_v21 = vadd.f32 %v1020_v53, %v476_v19 }
  0xf6   : > { %593 = vst.msk [vmem:[%s1029_s24 + $0x3c] sm:$0xf] %vm577_vm1, %v560_v15 }
  0xf7   : > { %v536_v22 = vmax.f32 %v504_v20, 0.0  ;;  %v544_v23 = vmax.f32 %v512_v21, 0.0 }
  0xf9   : > { %v568_v24 = vpack.c.bf16 %v536_v22, %v536_v22  ;;  %v576_v25 = vpack.c.bf16 %v544_v23, %v544_v23 }
  0xfb   : > { %601 = vst.msk [vmem:[%s1029_s24 + $0x5c] sm:$0xf] %vm577_vm1, %v568_v24 }
  0xfc   : > { %609 = vst.msk [vmem:[%s1029_s24 + $0x7c] sm:$0xf] %vm577_vm1, %v576_v25 }
  0xfd PF: > { %p14_p7 = scmp.ge.s32.totalorder %s895_s20, 4   ;;  %s1176_s15 = smov %s838_s16 }
  0xfe   : > { %s1177_s16 = smov %s842_s17  ;;  %s1178_s17 = smov %s905_s23 }
  0xff   : > { %s1179_s18 = smov %s895_s20  ;;  %16 = sbr.rel (!%p14_p7) target bundleno = 3 (0x3), region = 76 }
 0x104   :  { %632 = vsyncpa [#allocation3], 1 }
 0x105   :  { %634 = vsyncpa [#allocation3 + $0x1], 1 }

// kernel: bottleneck_forward.5
= control target key start
LH: loop header
LB: loop body
LE: loop exit
PB: predicated region body
PF: predicated region fallthrough
CT: control target
= control target key end

     0   :  { %10 = vsyncpa [#allocation3], 0  ;;  %s1345_s0 = inlined_call_operand.vmem [shape: bf16[512,16], index: 0, kind: input, shape index: {}]   ;;  %s1346_s1 = inlined_call_operand.vmem [shape: bf16[16,64], index: 1, kind: input, shape index: {}]   ;;  %s1347_s2 = inlined_call_operand.vmem [shape: f32[1,64], index: 2, kind: input, shape index: {}]   ;;  %s1348_s3 = inlined_call_operand.vmem [shape: f32[1,64], index: 3, kind: input, shape index: {}]   ;;  %s1349_s4 = inlined_call_operand.vmem [shape: f32[512,64], index: 4, kind: input, shape index: {}]   ;;  %s1350_s5 = inlined_call_operand.hbm [shape: f32[512,64], index: 5, kind: output, shape index: {}]  }
   0x1   :  { %12 = vsyncpa [#allocation3 + $0x1], 0  ;;  %s1056_s18 = smov 0   ;;  %s1058_s19 = smov 0  }
   0x2   :  { %s1060_s20 = smov 0   ;;  %s1062_s21 = smov 0  }
   0x3 LB: > { %s1077_s22 = sadd.s32 4294967295, %s1022_s21   ;;  %s798_s23 = sadd.s32 4294967294, %s1022_s21   ;;  %s1022_s21 = sphi %s1062_s21, %s1356_s21   ;;  %s1018_s20 = sphi %s1060_s20, %s1355_s20   ;;  %s1014_s19 = sphi %s1058_s19, %s1354_s19   ;;  %s1010_s18 = sphi %s1056_s18, %s1353_s18  }
   0x4   : > { %s1081_s24 = sadd.s32 1, %s1022_s21   ;;  %s140_s25 = sadd.s32 1, %s1018_s20 }
   0x5   : > { %s137_s26 = ssub.s32 %s1022_s21, %s1081_s24  ;;  %p150_p0 = scmp.ne.s32.totalorder %s1018_s20, %s1014_s19 }
   0x6   : > { %p138_p1 = scmp.eq.s32.totalorder %s137_s26, 0  ;;  %p151_p2 = scmp.eq.s32.totalorder %s1077_s22, 1 }
   0x7   : > { %p156_p3 = scmp.ne.s32.totalorder %s1014_s19, %s1010_s18  ;;  %p157_p4 = scmp.eq.s32.totalorder %s798_s23, 1 }
   0x8   : > { %s1092_s27 = scalar_select %p138_p1, %s1018_s20, %s140_s25  }
   0x9   : > { %p1094_p5 = por %p151_p2, %p150_p0  ;;  %p1098_p6 = por %p157_p4, %p156_p3 }
   0xa   : > { %p801_p7 = scmp.ge.s32.totalorder %s1022_s21, 1  ;;  %p202_p8 = scmp.lt.s32.totalorder %s1022_s21, 3 }
   0xc   : > { %p203_p9 = pnand %p801_p7, %p202_p8 }
   0xd   : > { %s803_s7 = sshll.u32 (!%p203_p9), %s1077_s22, 5  ;;  %s232_s26 = sand.u32 (!%p203_p9), 1, %s1014_s19  }
   0xe   : > { %206 = sbr.rel (%p203_p9) target bundleno = 226 (0xe2), region = 40  ;;  %p236_p10 = scmp.lt.s32.totalorder (!%p203_p9), %s803_s7, 63 }
   0xf   : > { %s802_s30 = sshll.u32 (!%p203_p9), %s232_s26, 8 }
  0x10   : > { %s1157_s6 = scalar_lea.vmem (!%p203_p9), [#allocation2], %s802_s30 }
  0x13   : > { %v912_v0 = vld [vmem:[%s1346_s1] sm:$0xff]  ;;  %s1358_s7 = smov (!%p236_p10, %s803_s7), 63  ;;  %vm369_vm0 = vcmask 130048   ;;  %vm675_vm1 = vcmask 523264  }
  0x14   : > { %425 = vmatpush.bf16.msra.mxu0 %v912_v0  ;;  %914 = vmatpush.bf16.msra.mxu1 %v912_v0  ;;  %s804_s8 = sshll.u32 %s1358_s7, 2  ;;  %s806_s12 = sshll.u32 %s1358_s7, 3  ;;  %v1134_v17 = vld [vmem:[%s1347_s2] ss:$0 sm:$0xff] }
  0x15   : > { %915 = vmatpush.bf16.msra.mxu2 %v912_v0  ;;  %916 = vmatpush.bf16.msra.mxu3 %v912_v0  ;;  %s239_s11 = scalar_lea.vmem %s1345_s0, %s804_s8  ;;  %s1139_s17 = scalar_lea.vmem %s1349_s4, %s806_s12  ;;  %v1144_v18 = vld [vmem:[%s1348_s3] ss:$0 sm:$0xff] }
  0x16   : > { %v896_v1 = vld [vmem:[%s239_s11] sm:$0xff]  ;;  %v897_v5 = vld [vmem:[%s239_s11 + $0x8] sm:$0xff]  ;;  %v898_v9 = vld [vmem:[%s239_s11 + $0x10] sm:$0xff]  ;;  %s913_s7 = sshll.u32 %s1077_s22, 8  ;;  %s721_s22 = sshll.u32 %s1157_s6, 4  ;;  %s722_s22 = int_to_ptr.vmem [resolvable:$true] %s721_s22 }
  0x17   : > { %v900_v2 = vld [vmem:[%s239_s11 + $0x20] sm:$0xff]  ;;  %875 = vmatmul.msk.bf16.vlgmr.msra.gmra.mxu0 %vm369_vm0, %v896_v1  ;;  %v901_v6 = vld [vmem:[%s239_s11 + $0x28] sm:$0xff]  ;;  %v902_v10 = vld [vmem:[%s239_s11 + $0x30] sm:$0xff]  ;;  %s720_s10 = scalar_lea.hbm %s1350_s5, %s913_s7  ;;  %s709_s12 = scalar_lea.sflag [#allocation3], %s232_s26 }
  0x18   : > { %v904_v3 = vld [vmem:[%s239_s11 + $0x40] sm:$0xff]  ;;  %879 = vmatmul.msk.bf16.vlgmr.msra.gmra.mxu1 %vm369_vm0, %v900_v2  ;;  %v905_v7 = vld [vmem:[%s239_s11 + $0x48] sm:$0xff]  ;;  %v906_v11 = vld [vmem:[%s239_s11 + $0x50] sm:$0xff] }
  0x19   : > { %v908_v4 = vld [vmem:[%s239_s11 + $0x60] sm:$0xff]  ;;  %883 = vmatmul.msk.bf16.vlgmr.msra.gmra.mxu2 %vm369_vm0, %v904_v3  ;;  %v909_v8 = vld [vmem:[%s239_s11 + $0x68] sm:$0xff]  ;;  %v910_v12 = vld [vmem:[%s239_s11 + $0x70] sm:$0xff] }
  0x1a   : > { %887 = vmatmul.msk.bf16.vlgmr.msra.gmra.mxu3 %vm369_vm0, %v908_v4  ;;  %v899_v13 = vld [vmem:[%s239_s11 + $0x18] sm:$0xff]  ;;  %v579_v23 = vld [vmem:[%s1139_s17] sm:$0xff]  ;;  %v580_v43 = vld [vmem:[%s1139_s17 + $0x8] sm:$0xff] }
  0x1b   : > { %v903_v14 = vld [vmem:[%s239_s11 + $0x38] sm:$0xff]  ;;  %v587_v24 = vld [vmem:[%s1139_s17 + $0x40] sm:$0xff]  ;;  %v588_v44 = vld [vmem:[%s1139_s17 + $0x48] sm:$0xff] }
  0x1c   : > { %v907_v15 = vld [vmem:[%s239_s11 + $0x58] sm:$0xff]  ;;  %v595_v37 = vld [vmem:[%s1139_s17 + $0x80] sm:$0xff]  ;;  %v596_v61 = vld [vmem:[%s1139_s17 + $0x88] sm:$0xff] }
  0x1d   : > { %v911_v16 = vld [vmem:[%s239_s11 + $0x78] sm:$0xff]  ;;  %v603_v38 = vld [vmem:[%s1139_s17 + $0xc0] sm:$0xff]  ;;  %v604_v62 = vld [vmem:[%s1139_s17 + $0xc8] sm:$0xff]  ;;  %s723_s11 = sshll.u32 %s720_s10, 4  ;;  %s724_s11 = int_to_ptr.hbm [resolvable:$true] %s723_s11 }
  0x1e   : > { %v581_v3 = vld [vmem:[%s1139_s17 + $0x10] sm:$0xff]  ;;  %s974_s13 = sshra.s32 %s724_s11, 4  ;;  %s975_s13 = int_to_ptr.hbm [resolvable:$true] %s974_s13 }
  0x1f   : > { %v589_v4 = vld [vmem:[%s1139_s17 + $0x50] sm:$0xff]  ;;  %s976_s14 = scalar_lea.hbm %s975_s13, 256  ;;  %p981_p0 = scmp.lt.s32.totalorder %s975_s13, %s1350_s5 }
  0x20   : > { %p977_p11 = scmp.ne.s32.totalorder %s975_s13, %s976_s14 }
  0x22   : > { %p978_p12 = pnand %p977_p11, %p1094_p5 }
  0x24   : > { %p979_p13 = pneg %p978_p12 }
  0x27   : > { %876 = vmatmul.msk.bf16.gmra.mxu0 %vm369_vm0, %v897_v5 }
  0x28   : > { %880 = vmatmul.msk.bf16.gmra.mxu1 %vm369_vm0, %v901_v6 }
  0x29   : > { %884 = vmatmul.msk.bf16.gmra.mxu2 %vm369_vm0, %v905_v7 }
  0x2a   : > { %888 = vmatmul.msk.bf16.gmra.mxu3 %vm369_vm0, %v909_v8 }
  0x37   : > { %877 = vmatmul.msk.bf16.gmra.mxu0 %vm369_vm0, %v898_v9 }
  0x38   : > { %881 = vmatmul.msk.bf16.gmra.mxu1 %vm369_vm0, %v902_v10 }
  0x39   : > { %885 = vmatmul.msk.bf16.gmra.mxu2 %vm369_vm0, %v906_v11 }
  0x3a   : > { %889 = vmatmul.msk.bf16.gmra.mxu3 %vm369_vm0, %v910_v12 }
  0x47   : > { %878 = vmatmul.msk.bf16.gmra.mxu0 %vm369_vm0, %v899_v13 }
  0x48   : > { %882 = vmatmul.msk.bf16.gmra.mxu1 %vm369_vm0, %v903_v14 }
  0x49   : > { %886 = vmatmul.msk.bf16.gmra.mxu2 %vm369_vm0, %v907_v15 }
  0x4a   : > { %890 = vmatmul.msk.bf16.gmra.mxu3 %vm369_vm0, %v911_v16 }
  0x94   : > { %v427_v19 = vpop.f32.mrf.mxu0 }
  0x95   : > { %v447_v20 = vpop.f32.mrf.mxu1  ;;  %v511_v21 = vmul.f32 %v1134_v17, %v427_v19 }
  0x96   : > { %v519_v22 = vmul.f32 %v1134_v17, %v447_v20 }
  0x97   : > { %v547_v25 = vadd.f32 %v1144_v18, %v511_v21 }
  0x98   : > { %v555_v26 = vadd.f32 %v1144_v18, %v519_v22 }
  0x99   : > { %v611_v27 = vadd.f32 %v579_v23, %v547_v25  ;;  %v597_v23 = vld [vmem:[%s1139_s17 + $0x90] sm:$0xff] }
  0x9a   : > { %v619_v28 = vadd.f32 %v587_v24, %v555_v26  ;;  %v605_v24 = vld [vmem:[%s1139_s17 + $0xd0] sm:$0xff] }
  0x9b   : > { %v643_v29 = vmax.f32 %v611_v27, 0.0 }
  0x9c   : > { %v651_v30 = vmax.f32 %v619_v28, 0.0  ;;  %v467_v31 = vpop.f32.mrf.mxu2  ;;  %v429_v35 = vpop.f32.mrf.mxu0 }
  0x9d   : > { %v487_v32 = vpop.f32.mrf.mxu3  ;;  %v527_v33 = vmul.f32 %v1134_v17, %v467_v31  ;;  %v449_v36 = vpop.f32.mrf.mxu1  ;;  %676 = vst.msk [vmem:[%s1157_s6] sm:$0xff] %vm675_vm1, %v643_v29  ;;  %v512_v39 = vmul.f32 %v1134_v17, %v429_v35  ;;  %v582_v29 = vld [vmem:[%s1139_s17 + $0x18] sm:$0xff] }
  0x9e   : > { %v535_v34 = vmul.f32 %v1134_v17, %v487_v32  ;;  %v520_v40 = vmul.f32 %v1134_v17, %v449_v36  ;;  %684 = vst.msk [vmem:[%s1157_s6 + $0x40] sm:$0xff] %vm675_vm1, %v651_v30  ;;  %v590_v30 = vld [vmem:[%s1139_s17 + $0x58] sm:$0xff] }
  0x9f   : > { %v563_v41 = vadd.f32 %v1144_v18, %v527_v33  ;;  %v548_v45 = vadd.f32 %v1144_v18, %v512_v39 }
  0xa0   : > { %v571_v42 = vadd.f32 %v1144_v18, %v535_v34  ;;  %v556_v46 = vadd.f32 %v1144_v18, %v520_v40 }
  0xa1   : > { %v627_v47 = vadd.f32 %v595_v37, %v563_v41  ;;  %v612_v49 = vadd.f32 %v580_v43, %v548_v45 }
  0xa2   : > { %v635_v48 = vadd.f32 %v603_v38, %v571_v42  ;;  %v620_v50 = vadd.f32 %v588_v44, %v556_v46 }
  0xa3   : > { %v659_v51 = vmax.f32 %v627_v47, 0.0  ;;  %v644_v53 = vmax.f32 %v612_v49, 0.0  ;;  %v598_v47 = vld [vmem:[%s1139_s17 + $0x98] sm:$0xff] }
  0xa4   : > { %v667_v52 = vmax.f32 %v635_v48, 0.0  ;;  %v652_v54 = vmax.f32 %v620_v50, 0.0  ;;  %v469_v55 = vpop.f32.mrf.mxu2  ;;  %v432_v59 = vpop.f32.mrf.mxu0  ;;  %v606_v48 = vld [vmem:[%s1139_s17 + $0xd8] sm:$0xff] }
  0xa5   : > { %v489_v56 = vpop.f32.mrf.mxu3  ;;  %692 = vst.msk [vmem:[%s1157_s6 + $0x80] sm:$0xff] %vm675_vm1, %v659_v51  ;;  %v528_v57 = vmul.f32 %v1134_v17, %v469_v55  ;;  %v452_v60 = vpop.f32.mrf.mxu1  ;;  %v513_v63 = vmul.f32 %v1134_v17, %v432_v59 }
  0xa6   : > { %v536_v58 = vmul.f32 %v1134_v17, %v489_v56  ;;  %700 = vst.msk [vmem:[%s1157_s6 + $0xc0] sm:$0xff] %vm675_vm1, %v667_v52  ;;  %v521_v0 = vmul.f32 %v1134_v17, %v452_v60 }
  0xa7   : > { %677 = vst.msk [vmem:[%s1157_s6 + $0x8] sm:$0xff] %vm675_vm1, %v644_v53  ;;  %v564_v1 = vadd.f32 %v1144_v18, %v528_v57  ;;  %v549_v5 = vadd.f32 %v1144_v18, %v513_v63  ;;  %v583_v53 = vld [vmem:[%s1139_s17 + $0x20] sm:$0xff] }
  0xa8   : > { %v572_v2 = vadd.f32 %v1144_v18, %v536_v58  ;;  %685 = vst.msk [vmem:[%s1157_s6 + $0x48] sm:$0xff] %vm675_vm1, %v652_v54  ;;  %v557_v6 = vadd.f32 %v1144_v18, %v521_v0  ;;  %v591_v54 = vld [vmem:[%s1139_s17 + $0x60] sm:$0xff] }
  0xa9   : > { %v628_v7 = vadd.f32 %v596_v61, %v564_v1  ;;  %v613_v9 = vadd.f32 %v581_v3, %v549_v5 }
  0xaa   : > { %v636_v8 = vadd.f32 %v604_v62, %v572_v2  ;;  %v621_v10 = vadd.f32 %v589_v4, %v557_v6 }
  0xab   : > { %v660_v11 = vmax.f32 %v628_v7, 0.0  ;;  %v645_v13 = vmax.f32 %v613_v9, 0.0  ;;  %v599_v7 = vld [vmem:[%s1139_s17 + $0xa0] sm:$0xff] }
  0xac   : > { %v668_v12 = vmax.f32 %v636_v8, 0.0  ;;  %v653_v14 = vmax.f32 %v621_v10, 0.0  ;;  %v472_v15 = vpop.f32.mrf.mxu2  ;;  %v434_v21 = vpop.f32.mrf.mxu0  ;;  %v607_v8 = vld [vmem:[%s1139_s17 + $0xe0] sm:$0xff] }
  0xad   : > { %v492_v16 = vpop.f32.mrf.mxu3  ;;  %693 = vst.msk [vmem:[%s1157_s6 + $0x88] sm:$0xff] %vm675_vm1, %v660_v11  ;;  %v529_v19 = vmul.f32 %v1134_v17, %v472_v15  ;;  %v454_v22 = vpop.f32.mrf.mxu1  ;;  %v514_v25 = vmul.f32 %v1134_v17, %v434_v21 }
  0xae   : > { %v537_v20 = vmul.f32 %v1134_v17, %v492_v16  ;;  %701 = vst.msk [vmem:[%s1157_s6 + $0xc8] sm:$0xff] %vm675_vm1, %v668_v12  ;;  %v522_v26 = vmul.f32 %v1134_v17, %v454_v22 }
  0xaf   : > { %678 = vst.msk [vmem:[%s1157_s6 + $0x10] sm:$0xff] %vm675_vm1, %v645_v13  ;;  %v565_v27 = vadd.f32 %v1144_v18, %v529_v19  ;;  %v550_v31 = vadd.f32 %v1144_v18, %v514_v25  ;;  %v584_v13 = vld [vmem:[%s1139_s17 + $0x28] sm:$0xff] }
  0xb0   : > { %v573_v28 = vadd.f32 %v1144_v18, %v537_v20  ;;  %686 = vst.msk [vmem:[%s1157_s6 + $0x50] sm:$0xff] %vm675_vm1, %v653_v14  ;;  %v558_v32 = vadd.f32 %v1144_v18, %v522_v26  ;;  %v592_v14 = vld [vmem:[%s1139_s17 + $0x68] sm:$0xff] }
  0xb1   : > { %v629_v33 = vadd.f32 %v597_v23, %v565_v27  ;;  %v614_v35 = vadd.f32 %v582_v29, %v550_v31 }
  0xb2   : > { %v637_v34 = vadd.f32 %v605_v24, %v573_v28  ;;  %v622_v36 = vadd.f32 %v590_v30, %v558_v32 }
  0xb3   : > { %v661_v37 = vmax.f32 %v629_v33, 0.0  ;;  %v646_v39 = vmax.f32 %v614_v35, 0.0  ;;  %v600_v33 = vld [vmem:[%s1139_s17 + $0xa8] sm:$0xff] }
  0xb4   : > { %v669_v38 = vmax.f32 %v637_v34, 0.0  ;;  %v654_v40 = vmax.f32 %v622_v36, 0.0  ;;  %v474_v41 = vpop.f32.mrf.mxu2  ;;  %v437_v45 = vpop.f32.mrf.mxu0  ;;  %v608_v34 = vld [vmem:[%s1139_s17 + $0xe8] sm:$0xff] }
  0xb5   : > { %v494_v42 = vpop.f32.mrf.mxu3  ;;  %694 = vst.msk [vmem:[%s1157_s6 + $0x90] sm:$0xff] %vm675_vm1, %v661_v37  ;;  %v530_v43 = vmul.f32 %v1134_v17, %v474_v41  ;;  %v457_v46 = vpop.f32.mrf.mxu1  ;;  %v515_v49 = vmul.f32 %v1134_v17, %v437_v45 }
  0xb6   : > { %v538_v44 = vmul.f32 %v1134_v17, %v494_v42  ;;  %702 = vst.msk [vmem:[%s1157_s6 + $0xd0] sm:$0xff] %vm675_vm1, %v669_v38  ;;  %v523_v50 = vmul.f32 %v1134_v17, %v457_v46 }
  0xb7   : > { %679 = vst.msk [vmem:[%s1157_s6 + $0x18] sm:$0xff] %vm675_vm1, %v646_v39  ;;  %v566_v51 = vadd.f32 %v1144_v18, %v530_v43  ;;  %v551_v55 = vadd.f32 %v1144_v18, %v515_v49  ;;  %v585_v39 = vld [vmem:[%s1139_s17 + $0x30] sm:$0xff] }
  0xb8   : > { %v574_v52 = vadd.f32 %v1144_v18, %v538_v44  ;;  %687 = vst.msk [vmem:[%s1157_s6 + $0x58] sm:$0xff] %vm675_vm1, %v654_v40  ;;  %v559_v56 = vadd.f32 %v1144_v18, %v523_v50  ;;  %v593_v40 = vld [vmem:[%s1139_s17 + $0x70] sm:$0xff] }
  0xb9   : > { %v630_v57 = vadd.f32 %v598_v47, %v566_v51  ;;  %v615_v59 = vadd.f32 %v583_v53, %v551_v55 }
  0xba   : > { %v638_v58 = vadd.f32 %v606_v48, %v574_v52  ;;  %v623_v60 = vadd.f32 %v591_v54, %v559_v56 }
  0xbb   : > { %v662_v61 = vmax.f32 %v630_v57, 0.0  ;;  %v647_v63 = vmax.f32 %v615_v59, 0.0  ;;  %v601_v57 = vld [vmem:[%s1139_s17 + $0xb0] sm:$0xff] }
  0xbc   : > { %v670_v62 = vmax.f32 %v638_v58, 0.0  ;;  %v655_v0 = vmax.f32 %v623_v60, 0.0  ;;  %v477_v1 = vpop.f32.mrf.mxu2  ;;  %v439_v5 = vpop.f32.mrf.mxu0  ;;  %v609_v58 = vld [vmem:[%s1139_s17 + $0xf0] sm:$0xff] }
  0xbd   : > { %v497_v2 = vpop.f32.mrf.mxu3  ;;  %695 = vst.msk [vmem:[%s1157_s6 + $0x98] sm:$0xff] %vm675_vm1, %v662_v61  ;;  %v531_v3 = vmul.f32 %v1134_v17, %v477_v1  ;;  %v459_v6 = vpop.f32.mrf.mxu1  ;;  %v516_v9 = vmul.f32 %v1134_v17, %v439_v5 }
  0xbe   : > { %v539_v4 = vmul.f32 %v1134_v17, %v497_v2  ;;  %703 = vst.msk [vmem:[%s1157_s6 + $0xd8] sm:$0xff] %vm675_vm1, %v670_v62  ;;  %v524_v10 = vmul.f32 %v1134_v17, %v459_v6 }
  0xbf   : > { %680 = vst.msk [vmem:[%s1157_s6 + $0x20] sm:$0xff] %vm675_vm1, %v647_v63  ;;  %v567_v11 = vadd.f32 %v1144_v18, %v531_v3  ;;  %v552_v15 = vadd.f32 %v1144_v18, %v516_v9  ;;  %v586_v63 = vld [vmem:[%s1139_s17 + $0x38] sm:$0xff] }
  0xc0   : > { %v575_v12 = vadd.f32 %v1144_v18, %v539_v4  ;;  %688 = vst.msk [vmem:[%s1157_s6 + $0x60] sm:$0xff] %vm675_vm1, %v655_v0  ;;  %v560_v16 = vadd.f32 %v1144_v18, %v524_v10  ;;  %v594_v0 = vld [vmem:[%s1139_s17 + $0x78] sm:$0xff] }
  0xc1   : > { %v631_v19 = vadd.f32 %v599_v7, %v567_v11  ;;  %v616_v21 = vadd.f32 %v584_v13, %v552_v15  ;;  %v602_v15 = vld [vmem:[%s1139_s17 + $0xb8] sm:$0xff] }
  0xc2   : > { %v639_v20 = vadd.f32 %v607_v8, %v575_v12  ;;  %v624_v22 = vadd.f32 %v592_v14, %v560_v16  ;;  %v610_v16 = vld [vmem:[%s1139_s17 + $0xf8] sm:$0xff]  ;;  %s980_s17 = scalar_lea.hbm %s1350_s5, 512 }
  0xc3   : > { %v663_v23 = vmax.f32 %v631_v19, 0.0  ;;  %v648_v25 = vmax.f32 %v616_v21, 0.0  ;;  %p982_p1 = scmp.lt.s32.totalorder %s980_s17, %s976_s14 }
  0xc4   : > { %v671_v24 = vmax.f32 %v639_v20, 0.0  ;;  %v656_v26 = vmax.f32 %v624_v22, 0.0  ;;  %v479_v27 = vpop.f32.mrf.mxu2  ;;  %v442_v31 = vpop.f32.mrf.mxu0 }
  0xc5   : > { %v499_v28 = vpop.f32.mrf.mxu3  ;;  %696 = vst.msk [vmem:[%s1157_s6 + $0xa0] sm:$0xff] %vm675_vm1, %v663_v23  ;;  %v532_v29 = vmul.f32 %v1134_v17, %v479_v27  ;;  %v462_v32 = vpop.f32.mrf.mxu1  ;;  %v517_v35 = vmul.f32 %v1134_v17, %v442_v31  ;;  %p983_p2 = por %p982_p1, %p981_p0 }
  0xc6   : > { %v540_v30 = vmul.f32 %v1134_v17, %v499_v28  ;;  %704 = vst.msk [vmem:[%s1157_s6 + $0xe0] sm:$0xff] %vm675_vm1, %v671_v24  ;;  %v525_v36 = vmul.f32 %v1134_v17, %v462_v32 }
  0xc7   : > { %681 = vst.msk [vmem:[%s1157_s6 + $0x28] sm:$0xff] %vm675_vm1, %v648_v25  ;;  %v568_v37 = vadd.f32 %v1144_v18, %v532_v29  ;;  %v553_v41 = vadd.f32 %v1144_v18, %v517_v35  ;;  %p984_p3 = pnand %p983_p2, %p979_p13 }
  0xc8   : > { %v576_v38 = vadd.f32 %v1144_v18, %v540_v30  ;;  %689 = vst.msk [vmem:[%s1157_s6 + $0x68] sm:$0xff] %vm675_vm1, %v656_v26  ;;  %v561_v42 = vadd.f32 %v1144_v18, %v525_v36 }
  0xc9   : > { %v632_v43 = vadd.f32 %v600_v33, %v568_v37  ;;  %v617_v45 = vadd.f32 %v585_v39, %v553_v41 }
  0xca   : > { %v640_v44 = vadd.f32 %v608_v34, %v576_v38  ;;  %v625_v46 = vadd.f32 %v593_v40, %v561_v42 }
  0xcb   : > { %v664_v47 = vmax.f32 %v632_v43, 0.0  ;;  %v649_v49 = vmax.f32 %v617_v45, 0.0 }
  0xcc   : > { %v672_v48 = vmax.f32 %v640_v44, 0.0  ;;  %v657_v50 = vmax.f32 %v625_v46, 0.0  ;;  %v482_v51 = vpop.f32.mrf.mxu2  ;;  %v444_v55 = vpop.f32.mrf.mxu0 }
  0xcd   : > { %v502_v52 = vpop.f32.mrf.mxu3  ;;  %697 = vst.msk [vmem:[%s1157_s6 + $0xa8] sm:$0xff] %vm675_vm1, %v664_v47  ;;  %v533_v53 = vmul.f32 %v1134_v17, %v482_v51  ;;  %v464_v56 = vpop.f32.mrf.mxu1  ;;  %v518_v59 = vmul.f32 %v1134_v17, %v444_v55 }
  0xce   : > { %v541_v54 = vmul.f32 %v1134_v17, %v502_v52  ;;  %705 = vst.msk [vmem:[%s1157_s6 + $0xe8] sm:$0xff] %vm675_vm1, %v672_v48  ;;  %v526_v60 = vmul.f32 %v1134_v17, %v464_v56 }
  0xcf   : > { %682 = vst.msk [vmem:[%s1157_s6 + $0x30] sm:$0xff] %vm675_vm1, %v649_v49  ;;  %v569_v61 = vadd.f32 %v1144_v18, %v533_v53  ;;  %v554_v1 = vadd.f32 %v1144_v18, %v518_v59 }
  0xd0   : > { %v577_v62 = vadd.f32 %v1144_v18, %v541_v54  ;;  %690 = vst.msk [vmem:[%s1157_s6 + $0x70] sm:$0xff] %vm675_vm1, %v657_v50  ;;  %v562_v2 = vadd.f32 %v1144_v18, %v526_v60 }
  0xd1   : > { %v633_v3 = vadd.f32 %v601_v57, %v569_v61  ;;  %v618_v5 = vadd.f32 %v586_v63, %v554_v1 }
  0xd2   : > { %v641_v4 = vadd.f32 %v609_v58, %v577_v62  ;;  %v626_v6 = vadd.f32 %v594_v0, %v562_v2 }
  0xd3   : > { %v665_v7 = vmax.f32 %v633_v3, 0.0  ;;  %v650_v9 = vmax.f32 %v618_v5, 0.0 }
  0xd4   : > { %v673_v8 = vmax.f32 %v641_v4, 0.0  ;;  %v658_v10 = vmax.f32 %v626_v6, 0.0  ;;  %v484_v11 = vpop.f32.mrf.mxu2 }
  0xd5   : > { %v504_v12 = vpop.f32.mrf.mxu3  ;;  %698 = vst.msk [vmem:[%s1157_s6 + $0xb0] sm:$0xff] %vm675_vm1, %v665_v7  ;;  %v534_v13 = vmul.f32 %v1134_v17, %v484_v11 }
  0xd6   : > { %v542_v14 = vmul.f32 %v1134_v17, %v504_v12  ;;  %706 = vst.msk [vmem:[%s1157_s6 + $0xf0] sm:$0xff] %vm675_vm1, %v673_v8 }
  0xd7   : > { %683 = vst.msk [vmem:[%s1157_s6 + $0x38] sm:$0xff] %vm675_vm1, %v650_v9  ;;  %v570_v19 = vadd.f32 %v1144_v18, %v534_v13 }
  0xd8   : > { %v578_v20 = vadd.f32 %v1144_v18, %v542_v14  ;;  %691 = vst.msk [vmem:[%s1157_s6 + $0x78] sm:$0xff] %vm675_vm1, %v658_v10 }
  0xd9   : > { %v634_v17 = vadd.f32 %v602_v15, %v570_v19 }
  0xda   : > { %v642_v21 = vadd.f32 %v610_v16, %v578_v20 }
  0xdb   : > { %v666_v22 = vmax.f32 %v634_v17, 0.0 }
  0xdc   : > { %v674_v23 = vmax.f32 %v642_v21, 0.0 }
  0xdd   : > { %699 = vst.msk [vmem:[%s1157_s6 + $0xb8] sm:$0xff] %vm675_vm1, %v666_v22 }
  0xde   : > { %707 = vst.msk [vmem:[%s1157_s6 + $0xf8] sm:$0xff] %vm675_vm1, %v674_v23 }
  0xdf   : > { %987 = shalt.err (!%p984_p3)
}
  0xe0   : > { %s1024_s26 = smov 128   ;;  %s1025_s30 = smov 8  }
  0xe1   : > { %917 = dma.vmem_to_hbm [thread:$0]  (%p1094_p5), %s722_s22, 4096, %s724_s11, %s709_s12, %s1024_s26, %s1024_s26, %s1025_s30  }
  0xe2 PF: > { %p923_p4 = scmp.ge.s32.totalorder %s1022_s21, 2  ;;  %s738_s6 = sand.u32 1, %s1010_s18  }
  0xe3   : > { %s739_s7 = scalar_lea.sflag [#allocation3], %s738_s6 }
  0xe4   : > { %p920_p7 = pnand %p923_p4, %p1098_p6 }
  0xe6   : > { %p921_p8 = pneg %p920_p7 }
  0xe8   : > { %1005 = dma.done.wait (%p921_p8), %s739_s7, 4096  }
  0xe9   : > { %1007 = vsyncadd (%p921_p8), %s739_s7, 4294963200  ;;  %p15_p9 = scmp.ge.s32.totalorder %s1081_s24, 4   ;;  %s1353_s18 = smov %s1014_s19 }
  0xea   : > { %s1354_s19 = smov %s1018_s20  ;;  %s1355_s20 = smov %s1092_s27 }
  0xeb   : > { %s1356_s21 = smov %s1081_s24  ;;  %17 = sbr.rel (!%p15_p9) target bundleno = 3 (0x3), region = 78 }
  0xf0   :  { %745 = vsyncpa [#allocation3], 1 }
  0xf1   :  { %747 = vsyncpa [#allocation3 + $0x1], 1 }

// kernel: bottleneck_forward.4
= control target key start
LH: loop header
LB: loop body
LE: loop exit
PB: predicated region body
PF: predicated region fallthrough
CT: control target
= control target key end

     0   :  { %s1807_s15 = smov 0   ;;  %s1809_s16 = smov 0   ;;  %s2416_s0 = inlined_call_operand.vmem [shape: bf16[2,18,18,16], index: 0, kind: input, shape index: {}]   ;;  %s2417_s1 = inlined_call_operand.vmem [shape: bf16[3,48,16], index: 1, kind: input, shape index: {}]   ;;  %s2418_s2 = inlined_call_operand.vmem [shape: f32[1,16], index: 2, kind: input, shape index: {}]   ;;  %s2419_s3 = inlined_call_operand.vmem [shape: f32[1,16], index: 3, kind: input, shape index: {}]   ;;  %s2420_s4 = inlined_call_operand.vmem [shape: bf16[2,16,16,16], index: 4, kind: output, shape index: {}]  }
   0x1   :  { %s1811_s17 = smov 0  }
   0x2 LB: > { %s26_s18 = sadd.s32 1, %s1774_s16  ;;  %p1516_p0 = scmp.ge.s32.totalorder %s1778_s17, 1  ;;  %s1778_s17 = sphi %s1811_s17, %s14_s17   ;;  %s1774_s16 = sphi %s1809_s16, %s2422_s16   ;;  %s1770_s15 = sphi %s1807_s15, %s2421_s15  }
   0x3   : > { %p28_p1 = scmp.ge.s32.totalorder %s26_s18, 2  ;;  %p176_p2 = scmp.lt.s32.totalorder %s1778_s17, 3 }
   0x5   : > { %s2424_s18 = smov (%p28_p1, %s26_s18), 0  ;;  %p177_p3 = pnand %p1516_p0, %p176_p2 }
   0x6   : > { %p207_p4 = scmp.lt.s32.totalorder (!%p177_p3), %s1770_s15, 1  ;;  %s1780_s23 = smov (!%p177_p3), 32  }
   0x7   : > { %180 = sbr.rel (%p177_p3) target bundleno = 481 (0x1e1), region = 36  ;;  %s1781_s24 = smov (!%p177_p3), 16  }
   0xc   : > { %s2426_s15 = smov (!%p207_p4, %s1770_s15), 1  ;;  %vm635_vm0 = vcmask 1046528   ;;  %vm410_vm1 = vsmask.f32 7424  ;;  %vm716_vm2 = vcmask 130048   ;;  %vm749_vm3 = vcmask 261120  }
   0xd   : > { %s1727_s19 = smul.u32 216, %s2426_s15  ;;  %vm875_vm4 = vcmask 392192   ;;  %s1690_s25 = sshll.u32 %s2426_s15, 7  ;;  %vm1390_vm5 = vcmask 125952  }
   0xe   : > { %s2212_s28 = scalar_lea.vmem %s2420_s4, %s1690_s25 }
   0xf   : > { %s1831_s22 = scalar_lea.vmem %s2416_s0, %s1727_s19 }
  0x10   : > { %v1834_v0 = vld [vmem:[%s1831_s22 + $0x18] sm:$0xff]  ;;  %v236_v1 = vld [vmem:[%s1831_s22 + $0x20] sm:$0x1]  ;;  %v269_v4 = vld [vmem:[%s1831_s22 + $0xa4] sm:$0x1] }
  0x11   : > { %v1838_v2 = vld [vmem:[%s1831_s22 + $0x9c] sm:$0xff]  ;;  %v380_v3 = vunpack.c.l.b16 %v236_v1  ;;  %v436_v5 = vshrl.u32 %v1834_v0, 16  ;;  %v438_v6 = vshll.u32 %v1834_v0, 16  ;;  %v391_v7 = vunpack.c.l.b16 %v269_v4  ;;  %v230_v11 = vld [vmem:[%s1831_s22 + $0x8] sm:$0x1]  ;;  %v1862_v38 = vld [vmem:[%s1831_s22 + $0xc] sm:$0xff] }
  0x12   : > { %v642_v9 = vrot.slane %v1834_v0, 1  ;;  %v570_v10 = vshll.u32 %v1838_v2, 16  ;;  %v568_v17 = vshrl.u32 %v1838_v2, 16  ;;  %v233_v18 = vld [vmem:[%s1831_s22 + $0x14] sm:$0x1]  ;;  %v378_v19 = vunpack.c.l.b16 %v230_v11  ;;  %v1854_v28 = vld [vmem:[%s1831_s22] sm:$0xff] }
  0x13   : > { %v396_v8 = vpack.c.b16 %v380_v3, %v380_v3  ;;  %v440_v12 = vrot.slane %v438_v6, 1  ;;  %v407_v13 = vpack.c.b16 %v391_v7, %v391_v7  ;;  %v675_v25 = vrot.slane %v1838_v2, 1  ;;  %v239_v32 = vld [vmem:[%s1831_s22 + $0x2c] sm:$0x1]  ;;  %v272_v33 = vld [vmem:[%s1831_s22 + $0xb0] sm:$0x1] }
  0x14   : > { %v572_v22 = vrot.slane %v570_v10, 1  ;;  %v379_v27 = vunpack.c.l.b16 %v233_v18  ;;  %v394_v29 = vpack.c.b16 %v378_v19, %v378_v19  ;;  %v412_v34 = vshrl.u32 %v1854_v28, 16  ;;  %v1866_v44 = vld [vmem:[%s1831_s22 + $0xa8] sm:$0xff]  ;;  %v275_v57 = vld [vmem:[%s1831_s22 + $0xbc] sm:$0x1]  ;;  %v1887_v4 = vld [vmem:[%s1831_s22 + $0xb4] sm:$0xff] }
  0x15   : > { %v643_v14 = vrot.slane %v396_v8, 1  ;;  %v443_v15 = vshll.u32 %v396_v8, 16  ;;  %v441_v16 = vor.u32 %v440_v12, %v436_v5  ;;  %v575_v23 = vshll.u32 %v407_v13, 16  ;;  %v1875_v54 = vld [vmem:[%s1831_s22 + $0x24] sm:$0xff]  ;;  %v242_v61 = vld [vmem:[%s1831_s22 + $0x38] sm:$0x1] }
  0x16   : > { %v676_v26 = vrot.slane %v407_v13, 1  ;;  %v573_v30 = vor.u32 %v572_v22, %v568_v17  ;;  %v414_v35 = vshll.u32 %v1854_v28, 16  ;;  %v419_v36 = vshll.u32 %v394_v29, 16  ;;  %v1894_v12 = vld [vmem:[%s1831_s22 + $0x30] sm:$0xff] }
  0x17   : > { %v644_v20 = vsel %vm635_vm0, %v642_v9, %v643_v14  ;;  %v445_v21 = vrot.slane %v443_v15, 1  ;;  %v577_v31 = vrot.slane %v575_v23, 1  ;;  %v395_v39 = vpack.c.b16 %v379_v27, %v379_v27 }
  0x18   : > { %688 = vrot.lane.b32.xlu1 %v644_v20, %s1780_s23  ;;  %v677_v37 = vsel %vm635_vm0, %v675_v25, %v676_v26  ;;  %v416_v40 = vrot.slane %v414_v35, 1  ;;  %v421_v41 = vrot.slane %v419_v36, 1  ;;  %v381_v43 = vunpack.c.l.b16 %v239_v32  ;;  %v245_v20 = vld [vmem:[%s1831_s22 + $0x44] sm:$0x1]  ;;  %v1907_v32 = vld [vmem:[%s1831_s22 + $0x3c] sm:$0xff] }
  0x19   : > { %v446_v24 = vsel %vm410_vm1, %v441_v16, %v445_v21  ;;  %v578_v42 = vsel %vm410_vm1, %v573_v30, %v577_v31  ;;  %v392_v45 = vunpack.c.l.b16 %v272_v33  ;;  %v424_v47 = vshrl.u32 %v1862_v38, 16 }
  0x1a   : > { %607 = vrot.lane.b32.xlu0 %v446_v24, %s1781_s24  ;;  %v417_v46 = vor.u32 %v416_v40, %v412_v34  ;;  %v426_v48 = vshll.u32 %v1862_v38, 16  ;;  %v639_v49 = vrot.slane %v1862_v38, 1  ;;  %v640_v50 = vrot.slane %v395_v39, 1 }
  0x1b   : > { %v431_v51 = vshll.u32 %v395_v39, 16  ;;  %v636_v52 = vrot.slane %v1854_v28, 1  ;;  %v637_v53 = vrot.slane %v394_v29, 1  ;;  %v397_v58 = vpack.c.b16 %v381_v43, %v381_v43 }
  0x1c   : > { %v422_v55 = vsel %vm410_vm1, %v417_v46, %v421_v41  ;;  %v428_v56 = vrot.slane %v426_v48, 1  ;;  %v1879_v59 = vpack.c.b16 %v392_v45, %v392_v45  ;;  %v582_v60 = vshll.u32 %v1866_v44, 16 }
  0x1d   : > { %603 = vrot.lane.b32.xlu2 %v422_v55, %s1781_s24  ;;  %v433_v63 = vrot.slane %v431_v51, 1  ;;  %v450_v1 = vshll.u32 %v1875_v54, 16  ;;  %v641_v3 = vsel %vm635_vm0, %v639_v49, %v640_v50  ;;  %v393_v5 = vunpack.c.l.b16 %v275_v57 }
  0x1e   : > { %v429_v62 = vor.u32 %v428_v56, %v424_v47  ;;  %v638_v6 = vsel %vm635_vm0, %v636_v52, %v637_v53  ;;  %v645_v7 = vrot.slane %v1875_v54, 1  ;;  %v580_v8 = vshrl.u32 %v1866_v44, 16  ;;  %v278_v53 = vld [vmem:[%s1831_s22 + $0xc8] sm:$0x1] }
  0x1f   : > { %v646_v9 = vrot.slane %v397_v58, 1  ;;  %v584_v10 = vrot.slane %v582_v60, 1  ;;  %v587_v11 = vshll.u32 %v1879_v59, 16  ;;  %v382_v13 = vunpack.c.l.b16 %v242_v61 }
  0x20   : > { %710 = vrot.lane.b32.xlu1 %v677_v37, %s1780_s23  ;;  %v434_v14 = vsel %vm410_vm1, %v429_v62, %v433_v63  ;;  %v448_v15 = vshrl.u32 %v1875_v54, 16  ;;  %v452_v16 = vrot.slane %v450_v1, 1  ;;  %v455_v17 = vshll.u32 %v397_v58, 16 }
  0x21   : > { %v409_v18 = vpack.c.b16 %v393_v5, %v393_v5  ;;  %v594_v19 = vshll.u32 %v1887_v4, 16  ;;  %v585_v21 = vor.u32 %v584_v10, %v580_v8  ;;  %v589_v22 = vrot.slane %v587_v11, 1  ;;  %v248_v8 = vld [vmem:[%s1831_s22 + $0x50] sm:$0x1] }
  0x22   : > { %629 = vrot.lane.b32.xlu0 %v578_v42, %s1781_s24  ;;  %v398_v23 = vpack.c.b16 %v382_v13, %v382_v13  ;;  %v462_v24 = vshll.u32 %v1894_v12, 16  ;;  %v647_v25 = vsel %vm635_vm0, %v645_v7, %v646_v9  ;;  %v453_v26 = vor.u32 %v452_v16, %v448_v15  ;;  %v1937_v10 = vld [vmem:[%s1831_s22 + $0x90] sm:$0xff] }
  0x23   : > { %v457_v27 = vrot.slane %v455_v17, 1  ;;  %v592_v29 = vshrl.u32 %v1887_v4, 16  ;;  %v596_v30 = vrot.slane %v594_v19, 1  ;;  %v599_v31 = vshll.u32 %v409_v18, 16 }
  0x24   : > { %v383_v33 = vunpack.c.l.b16 %v245_v20  ;;  %v590_v34 = vsel %vm410_vm1, %v585_v21, %v589_v22  ;;  %v460_v35 = vshrl.u32 %v1894_v12, 16  ;;  %v464_v36 = vrot.slane %v462_v24, 1  ;;  %v1946_v22 = vld [vmem:[%s1831_s22 + $0x48] sm:$0xff] }
  0x25   : > { %605 = vrot.lane.b32.xlu2 %v434_v14, %s1781_s24  ;;  %v467_v37 = vshll.u32 %v398_v23, 16  ;;  %v458_v39 = vsel %vm410_vm1, %v453_v26, %v457_v27  ;;  %v597_v40 = vor.u32 %v596_v30, %v592_v29  ;;  %v601_v41 = vrot.slane %v599_v31, 1  ;;  %v251_v29 = vld [vmem:[%s1831_s22 + $0x5c] sm:$0x1] }
  0x26   : > { %v399_v42 = vpack.c.b16 %v383_v33, %v383_v33  ;;  %v474_v43 = vshll.u32 %v1907_v32, 16  ;;  %v465_v45 = vor.u32 %v464_v36, %v460_v35  ;;  %v678_v47 = vrot.slane %v1866_v44, 1  ;;  %v1961_v31 = vld [vmem:[%s2417_s1 + $0x38] sm:$0xff] }
  0x27   : > { %v469_v46 = vrot.slane %v467_v37, 1  ;;  %v679_v48 = vrot.slane %v1879_v59, 1  ;;  %v602_v49 = vsel %vm410_vm1, %v597_v40, %v601_v41  ;;  %v472_v50 = vshrl.u32 %v1907_v32, 16  ;;  %v1926_v59 = vld [vmem:[%s1831_s22 + $0xc0] sm:$0xff]  ;;  %v1967_v40 = vld [vmem:[%s1831_s22 + $0x54] sm:$0xff] }
  0x28   : > { %686 = vrot.lane.b32.xlu1 %v641_v3, %s1780_s23  ;;  %v476_v51 = vrot.slane %v474_v43, 1  ;;  %v479_v52 = vshll.u32 %v399_v42, 16  ;;  %v788_v60 = vunpack.c.l.b16 %v278_v53  ;;  %v681_v61 = vrot.slane %v1887_v4, 1  ;;  %v266_v3 = vld [vmem:[%s1831_s22 + $0x98] sm:$0x1] }
  0x29   : > { %v470_v55 = vsel %vm410_vm1, %v465_v45, %v469_v46  ;;  %v680_v56 = vsel %vm635_vm0, %v678_v47, %v679_v48  ;;  %v682_v62 = vrot.slane %v409_v18, 1  ;;  %v648_v63 = vrot.slane %v1894_v12, 1 }
  0x2a   : > { %684 = vrot.lane.b32.xlu0 %v638_v6, %s1780_s23  ;;  %v477_v57 = vor.u32 %v476_v51, %v472_v50  ;;  %v481_v58 = vrot.slane %v479_v52, 1  ;;  %v649_v1 = vrot.slane %v398_v23, 1  ;;  %v793_v5 = vshll.u32 %v1926_v59, 16  ;;  %v1951_v23 = vld [vmem:[%s2417_s1 + $0x40] sm:$0xff] }
  0x2b   : > { %v789_v7 = vpack.c.b16 %v788_v60, %v788_v60  ;;  %v683_v9 = vsel %vm635_vm0, %v681_v61, %v682_v62  ;;  %v390_v11 = vunpack.c.l.b16 %v266_v3  ;;  %v791_v14 = vshrl.u32 %v1926_v59, 16  ;;  %1138 = vmatpush.bf16.msra.mxu2 %v1951_v23 }
  0x2c   : > { %v482_v6 = vsel %vm410_vm1, %v477_v57, %v481_v58  ;;  %v650_v13 = vsel %vm635_vm0, %v648_v63, %v649_v1  ;;  %v795_v15 = vrot.slane %v793_v5, 1  ;;  %v804_v17 = vrot.slane %v1926_v59, 1  ;;  %v254_v63 = vld [vmem:[%s1831_s22 + $0x68] sm:$0x1] }
  0x2d   : > { %609 = vrot.lane.b32.xlu2 %v458_v39, %s1781_s24  ;;  %v798_v16 = vshll.u32 %v789_v7, 16  ;;  %v805_v18 = vrot.slane %v789_v7, 1  ;;  %v384_v19 = vunpack.c.l.b16 %v248_v8  ;;  %v651_v20 = vrot.slane %v1907_v32, 1 }
  0x2e   : > { %v652_v21 = vrot.slane %v399_v42, 1  ;;  %v406_v24 = vpack.c.b16 %v390_v11, %v390_v11  ;;  %v796_v26 = vor.u32 %v795_v15, %v791_v14  ;;  %v486_v30 = vshll.u32 %v1946_v22, 16  ;;  %v1990_v14 = vld [vmem:[%s1831_s22 + $0x60] sm:$0xff] }
  0x2f   : > { %v800_v27 = vrot.slane %v798_v16, 1  ;;  %v806_v33 = vsel %vm635_vm0, %v804_v17, %v805_v18  ;;  %v556_v36 = vshrl.u32 %v1937_v10, 16  ;;  %v385_v41 = vunpack.c.l.b16 %v251_v29  ;;  %1139 = vmatpush.bf16.msra.mxu2 %v1961_v31  ;;  %v2010_v29 = vld [vmem:[%s2417_s1 + $0x30] sm:$0xff] }
  0x30   : > { %690 = vrot.lane.b32.xlu1 %v647_v25, %s1780_s23  ;;  %v558_v25 = vshll.u32 %v1937_v10, 16  ;;  %v653_v35 = vsel %vm635_vm0, %v651_v20, %v652_v21  ;;  %v563_v39 = vshll.u32 %v406_v24, 16  ;;  %v484_v43 = vshrl.u32 %v1946_v22, 16  ;;  %v257_v20 = vld [vmem:[%s1831_s22 + $0x74] sm:$0x1]  ;;  %v2001_v21 = vld [vmem:[%s1831_s22 + $0x6c] sm:$0xff] }
  0x31   : > { %v801_v42 = vsel %vm410_vm1, %v796_v26, %v800_v27  ;;  %v488_v45 = vrot.slane %v486_v30, 1  ;;  %v654_v47 = vrot.slane %v1946_v22, 1  ;;  %v401_v51 = vpack.c.b16 %v385_v41, %v385_v41  ;;  %v1714_v27 = vld [vmem:[%s2417_s1 + $0x28] sm:$0xff] }
  0x32   : > { %631 = vrot.lane.b32.xlu0 %v590_v34, %s1781_s24  ;;  %v400_v34 = vpack.c.b16 %v384_v19, %v384_v19  ;;  %v560_v37 = vrot.slane %v558_v25, 1  ;;  %v565_v50 = vrot.slane %v563_v39, 1  ;;  %v498_v52 = vshll.u32 %v1967_v40, 16  ;;  %1718 = vmatpush.bf16.msra.mxu3 %v1714_v27  ;;  %v1713_v39 = vld [vmem:[%s2417_s1 + $0x20] sm:$0xff] }
  0x33   : > { %v489_v53 = vor.u32 %v488_v45, %v484_v43  ;;  %v496_v58 = vshrl.u32 %v1967_v40, 16  ;;  %v503_v61 = vshll.u32 %v401_v51, 16  ;;  %v657_v1 = vrot.slane %v1967_v40, 1  ;;  %1140 = vmatpush.bf16.msra.mxu2 %v2010_v29  ;;  %913 = vmatpush.bf16.msra.mxu0 %v1714_v27  ;;  %v1712_v43 = vld [vmem:[%s2417_s1 + $0x18] sm:$0xff] }
  0x34   : > { %v491_v46 = vshll.u32 %v400_v34, 16  ;;  %v655_v48 = vrot.slane %v400_v34, 1  ;;  %v500_v60 = vrot.slane %v498_v52, 1  ;;  %v658_v3 = vrot.slane %v401_v51, 1  ;;  %v260_v51 = vld [vmem:[%s1831_s22 + $0x80] sm:$0x1] }
  0x35   : > { %712 = vrot.lane.b32.xlu2 %v680_v56, %s1780_s23  ;;  %v386_v7 = vunpack.c.l.b16 %v254_v63  ;;  %v672_v8 = vrot.slane %v1937_v10, 1  ;;  %v660_v17 = vrot.slane %v1990_v14, 1  ;;  %v522_v26 = vshll.u32 %v2001_v21, 16 }
  0x36   : > { %v656_v56 = vsel %vm635_vm0, %v654_v47, %v655_v48  ;;  %v501_v5 = vor.u32 %v500_v60, %v496_v58  ;;  %v659_v11 = vsel %vm635_vm0, %v657_v1, %v658_v3  ;;  %v520_v30 = vshrl.u32 %v2001_v21, 16  ;;  %1719 = vmatpush.bf16.msra.mxu3 %v1713_v39  ;;  %v1709_v58 = vld [vmem:[%s2417_s1] sm:$0xff] }
  0x37   : > { %v402_v15 = vpack.c.b16 %v386_v7, %v386_v7  ;;  %v510_v41 = vshll.u32 %v1990_v14, 16  ;;  %914 = vmatpush.bf16.msra.mxu0 %v1713_v39  ;;  %v508_v45 = vshrl.u32 %v1990_v14, 16 }
  0x38   : > { %633 = vrot.lane.b32.xlu1 %v602_v49, %s1781_s24  ;;  %v561_v49 = vor.u32 %v560_v37, %v556_v36 }
  0x39   : > { %v661_v18 = vrot.slane %v402_v15, 1  ;;  %v515_v47 = vshll.u32 %v402_v15, 16  ;;  %v263_v15 = vld [vmem:[%s1831_s22 + $0x8c] sm:$0x1] }
  0x3a   : > { %611 = vrot.lane.b32.xlu0 %v470_v55, %s1781_s24  ;;  %v493_v55 = vrot.slane %v491_v46, 1  ;;  %v566_v57 = vsel %vm410_vm1, %v561_v49, %v565_v50  ;;  %v512_v46 = vrot.slane %v510_v41, 1  ;;  %1720 = vmatpush.bf16.msra.mxu3 %v1712_v43  ;;  %v1710_v50 = vld [vmem:[%s2417_s1 + $0x8] sm:$0xff] }
  0x3b   : > { %v662_v19 = vsel %vm635_vm0, %v660_v17, %v661_v18  ;;  %v517_v49 = vrot.slane %v515_v47, 1  ;;  %915 = vmatpush.bf16.msra.mxu0 %v1712_v43  ;;  %v2051_v18 = vld [vmem:[%s1831_s22 + $0x84] sm:$0xff] }
  0x3c   : > { %v494_v62 = vsel %vm410_vm1, %v489_v53, %v493_v55  ;;  %v513_v48 = vor.u32 %v512_v46, %v508_v45  ;;  %v2033_v53 = vld [vmem:[%s1831_s22 + $0x78] sm:$0xff]  ;;  %v388_v55 = vunpack.c.l.b16 %v260_v51 }
  0x3d   : > { %692 = vrot.lane.b32.xlu2 %v650_v13, %s1780_s23  ;;  %v532_v60 = vshrl.u32 %v2033_v53, 16  ;;  %v666_v3 = vrot.slane %v2033_v53, 1 }
  0x3e   : > { %v518_v52 = vsel %vm410_vm1, %v513_v48, %v517_v49 }
  0x40   : > { %613 = vrot.lane.b32.xlu1 %v482_v6, %s1781_s24  ;;  %v505_v6 = vrot.slane %v503_v61, 1 }
  0x42   : > { %714 = vrot.lane.b32.xlu0 %v683_v9, %s1780_s23  ;;  %v673_v9 = vrot.slane %v406_v24, 1  ;;  %v506_v13 = vsel %vm410_vm1, %v501_v5, %v505_v6  ;;  %v387_v24 = vunpack.c.l.b16 %v257_v20 }
  0x44   : > { %v674_v16 = vsel %vm635_vm0, %v672_v8, %v673_v9  ;;  %v403_v25 = vpack.c.b16 %v387_v24, %v387_v24  ;;  %v663_v9 = vrot.slane %v2001_v21, 1 }
  0x45   : > { %802 = vrot.lane.b32.xlu2 %v801_v42, %s1781_s24  ;;  %v1711_v42 = vld [vmem:[%s2417_s1 + $0x10] sm:$0xff] }
  0x46   : > { %v527_v34 = vshll.u32 %v403_v25, 16  ;;  %1022 = vmatpush.bf16.msra.mxu1 %v1711_v42  ;;  %1721 = vmatpush.bf16.msrb.mxu3 %v1711_v42 }
  0x48   : > { %807 = vrot.lane.b32.xlu1 %v806_v33, %s1780_s23  ;;  %v524_v33 = vrot.slane %v522_v26, 1  ;;  %v529_v36 = vrot.slane %v527_v34, 1  ;;  %v669_v26 = vrot.slane %v2051_v18, 1 }
  0x4a   : > { %694 = vrot.lane.b32.xlu0 %v653_v35, %s1780_s23  ;;  %v525_v35 = vor.u32 %v524_v33, %v520_v30  ;;  %1023 = vmatpush.bf16.msra.mxu1 %v1710_v50 }
  0x4b   : > { %1722 = vmatpush.bf16.msrb.mxu3 %v1710_v50 }
  0x4c   : > { %v530_v37 = vsel %vm410_vm1, %v525_v35, %v529_v36 }
  0x4d   : > { %615 = vrot.lane.b32.xlu2 %v494_v62, %s1781_s24 }
  0x4e   : > { %1024 = vmatpush.bf16.msra.mxu1 %v1709_v58 }
  0x4f   : > { %1723 = vmatpush.bf16.msrb.mxu3 %v1709_v58 }
  0x50   : > { %696 = vrot.lane.b32.xlu1 %v656_v56, %s1780_s23  ;;  %v404_v56 = vpack.c.b16 %v388_v55, %v388_v55 }
  0x52   : > { %627 = vrot.lane.b32.xlu0 %v566_v57, %s1781_s24  ;;  %v534_v57 = vshll.u32 %v2033_v53, 16  ;;  %v539_v62 = vshll.u32 %v404_v56, 16  ;;  %v667_v5 = vrot.slane %v404_v56, 1  ;;  %v281_v56 = vld [vmem:[%s1831_s22 + $0xd4] sm:$0x1] }
  0x53   : > { %v819_v58 = vunpack.c.l.b16 %v281_v56 }
  0x54   : > { %v536_v61 = vrot.slane %v534_v57, 1  ;;  %v541_v1 = vrot.slane %v539_v62, 1  ;;  %v668_v7 = vsel %vm635_vm0, %v666_v3, %v667_v5  ;;  %v2098_v57 = vld [vmem:[%s1831_s22 + $0xcc] sm:$0xff] }
  0x55   : > { %708 = vrot.lane.b32.xlu2 %v674_v16, %s1780_s23  ;;  %v389_v16 = vunpack.c.l.b16 %v263_v15 }
  0x56   : > { %v537_v63 = vor.u32 %v536_v61, %v532_v60  ;;  %v820_v60 = vpack.c.b16 %v819_v58, %v819_v58  ;;  %v824_v61 = vshll.u32 %v2098_v57, 16  ;;  %v2194_v58 = vld [vmem:[%s2419_s3] ss:$0 sm:$0xff] }
  0x58   : > { %698 = vrot.lane.b32.xlu1 %v659_v11, %s1780_s23  ;;  %v542_v6 = vsel %vm410_vm1, %v537_v63, %v541_v1  ;;  %v664_v11 = vrot.slane %v403_v25, 1  ;;  %v822_v63 = vshrl.u32 %v2098_v57, 16  ;;  %v826_v1 = vrot.slane %v824_v61, 1 }
  0x59   : > { %v829_v3 = vshll.u32 %v820_v60, 16 }
  0x5a   : > { %617 = vrot.lane.b32.xlu0 %v506_v13, %s1781_s24  ;;  %v665_v13 = vsel %vm635_vm0, %v663_v9, %v664_v11 }
  0x5d   : > { %619 = vrot.lane.b32.xlu2 %v518_v52, %s1781_s24 }
  0x60   : > { %621 = vrot.lane.b32.xlu1 %v530_v37, %s1781_s24 }
  0x62   : > { %700 = vrot.lane.b32.xlu0 %v662_v19, %s1780_s23  ;;  %v405_v19 = vpack.c.b16 %v389_v16, %v389_v16 }
  0x64   : > { %v670_v25 = vrot.slane %v405_v19, 1  ;;  %v551_v48 = vshll.u32 %v405_v19, 16 }
  0x65   : > { %702 = vrot.lane.b32.xlu2 %v665_v13, %s1780_s23 }
  0x66   : > { %v671_v33 = vsel %vm635_vm0, %v669_v26, %v670_v25  ;;  %v553_v52 = vrot.slane %v551_v48, 1 }
  0x68   : > { %704 = vrot.lane.b32.xlu1 %v668_v7, %s1780_s23  ;;  %v827_v7 = vor.u32 %v826_v1, %v822_v63 }
  0x6a   : > { %623 = vrot.lane.b32.xlu0 %v542_v6, %s1781_s24 }
  0x72   : > { %706 = vrot.lane.b32.xlu0 %v671_v33, %s1780_s23  ;;  %v836_v33 = vrot.slane %v820_v60, 1 }
  0x77   : > { %v604_v8 = vpop.permute.xlu2 %603 }
  0x78   : > { %v718_v43 = vsel %vm716_vm2, %v1854_v28, %v604_v8  ;;  %v544_v28 = vshrl.u32 %v2051_v18, 16  ;;  %v831_v8 = vrot.slane %v829_v3, 1 }
  0x7a   : > { %v832_v11 = vsel %vm410_vm1, %v827_v7, %v831_v8 }
  0x7b   : > { %833 = vrot.lane.b32.xlu1 %v832_v11, %s1781_s24 }
  0x7f   : > { %v606_v30 = vpop.permute.xlu2 %605 }
  0x80   : > { %v720_v37 = vsel %vm716_vm2, %v1862_v38, %v606_v30 }
  0x87   : > { %v610_v39 = vpop.permute.xlu2 %609 }
  0x88   : > { %v724_v38 = vsel %vm716_vm2, %v1875_v54, %v610_v39 }
  0x8a   : > { %v689_v17 = vpop.permute.xlu1 %688 }
  0x8c   : > { %v608_v20 = vpop.permute.xlu0 %607 }
  0x8d   : > { %v722_v24 = vsel %vm716_vm2, %v1834_v0, %v608_v20 }
  0x8e   : > { %v2057_v27 = vsel %vm749_vm3, %v722_v24, %v689_v17 }
  0x8f   : > { %1672 = vmatmul.msk.bf16.vlgmr.msra.gmra.mxu2 %vm875_vm4, %v2057_v27  ;;  %v713_v49 = vpop.permute.xlu2 %712 }
  0x92   : > { %v711_v34 = vpop.permute.xlu1 %710 }
  0x94   : > { %v630_v35 = vpop.permute.xlu0 %629 }
  0x95   : > { %v744_v36 = vsel %vm716_vm2, %v1838_v2, %v630_v35 }
  0x96   : > { %v2066_v0 = vsel %vm749_vm3, %v744_v36, %v711_v34 }
  0x97   : > { %1622 = vmatmul.msk.bf16.vlgmr.msra.gmra.mxu3 %vm875_vm4, %v2066_v0  ;;  %v693_v6 = vpop.permute.xlu2 %692 }
  0x98   : > { %1724 = vmatpush.bf16.msra.mxu3 %v1951_v23  ;;  %v546_v23 = vshll.u32 %v2051_v18, 16 }
  0x9a   : > { %v687_v41 = vpop.permute.xlu1 %686  ;;  %v548_v47 = vrot.slane %v546_v23, 1 }
  0x9b   : > { %v753_v42 = vsel %vm749_vm3, %v720_v37, %v687_v41 }
  0x9c   : > { %v685_v45 = vpop.permute.xlu0 %684  ;;  %1610 = vmatmul.msk.bf16.vlgmr.msra.gmra.mxu0 %vm875_vm4, %v753_v42  ;;  %1725 = vmatpush.bf16.msra.mxu3 %v1961_v31  ;;  %v549_v51 = vor.u32 %v548_v47, %v544_v28 }
  0x9d   : > { %v751_v2 = vsel %vm749_vm3, %v718_v43, %v685_v45 }
  0x9e   : > { %1638 = vmatmul.msk.bf16.vlgmr.msra.gmra.mxu1 %vm875_vm4, %v751_v2  ;;  %v554_v55 = vsel %vm410_vm1, %v549_v51, %v553_v52 }
  0x9f   : > { %625 = vrot.lane.b32.xlu2 %v554_v55, %s1781_s24  ;;  %v803_v17 = vpop.permute.xlu2 %802 }
  0xa0   : > { %1726 = vmatpush.bf16.msra.mxu3 %v2010_v29  ;;  %v810_v24 = vsel %vm716_vm2, %v1926_v59, %v803_v17 }
  0xa2   : > { %v691_v46 = vpop.permute.xlu1 %690 }
  0xa3   : > { %v757_v31 = vsel %vm749_vm3, %v724_v38, %v691_v46 }
  0xa4   : > { %v632_v50 = vpop.permute.xlu0 %631  ;;  %1673 = vmatmul.msk.bf16.gmra.mxu2 %vm875_vm4, %v757_v31 }
  0xa5   : > { %v746_v54 = vsel %vm716_vm2, %v1866_v44, %v632_v50 }
  0xa6   : > { %v2090_v29 = vsel %vm749_vm3, %v746_v54, %v713_v49 }
  0xa7   : > { %1623 = vmatmul.msk.bf16.gmra.mxu3 %vm875_vm4, %v2090_v29  ;;  %v616_v30 = vpop.permute.xlu2 %615 }
  0xa8   : > { %v730_v59 = vsel %vm716_vm2, %v1946_v22, %v616_v30 }
  0xaa   : > { %v634_v62 = vpop.permute.xlu1 %633 }
  0xab   : > { %v748_v13 = vsel %vm716_vm2, %v1887_v4, %v634_v62 }
  0xac   : > { %1611 = vmatmul.msk.bf16.gmra.mxu0 %vm875_vm4, %v2057_v27  ;;  %v612_v44 = vpop.permute.xlu0 %611 }
  0xad   : > { %v726_v5 = vsel %vm716_vm2, %v1894_v12, %v612_v44 }
  0xae   : > { %1639 = vmatmul.msk.bf16.gmra.mxu1 %vm875_vm4, %v753_v42  ;;  %v759_v9 = vsel %vm749_vm3, %v726_v5, %v693_v6 }
  0xaf   : > { %v709_v39 = vpop.permute.xlu2 %708 }
  0xb2   : > { %v614_v12 = vpop.permute.xlu1 %613 }
  0xb3   : > { %v728_v19 = vsel %vm716_vm2, %v1907_v32, %v614_v12  ;;  %v835_v32 = vrot.slane %v2098_v57, 1 }
  0xb4   : > { %1674 = vmatmul.msk.bf16.gmra.mxu2 %vm875_vm4, %v759_v9  ;;  %v715_v15 = vpop.permute.xlu0 %714 }
  0xb5   : > { %v2114_v16 = vsel %vm749_vm3, %v748_v13, %v715_v15 }
  0xb7   : > { %1624 = vmatmul.msk.bf16.gmra.mxu3 %vm875_vm4, %v2114_v16  ;;  %v620_v45 = vpop.permute.xlu2 %619 }
  0xb8   : > { %v734_v2 = vsel %vm716_vm2, %v1990_v14, %v620_v45 }
  0xba   : > { %v808_v26 = vpop.permute.xlu1 %807 }
  0xbb   : > { %v2128_v25 = vsel %vm749_vm3, %v810_v24, %v808_v26 }
  0xbc   : > { %1612 = vmatmul.msk.bf16.gmra.mxu0 %vm875_vm4, %v757_v31  ;;  %v695_v4 = vpop.permute.xlu0 %694 }
  0xbd   : > { %v761_v20 = vsel %vm749_vm3, %v728_v19, %v695_v4 }
  0xbe   : > { %1640 = vmatmul.msk.bf16.gmra.mxu1 %vm875_vm4, %v2057_v27  ;;  %v837_v27 = vsel %vm635_vm0, %v835_v32, %v836_v33 }
  0xbf   : > { %838 = vrot.lane.b32.xlu2 %v837_v27, %s1780_s23  ;;  %v703_v28 = vpop.permute.xlu2 %702 }
  0xc2   : > { %v697_v34 = vpop.permute.xlu1 %696 }
  0xc3   : > { %v763_v37 = vsel %vm749_vm3, %v730_v59, %v697_v34 }
  0xc4   : > { %1675 = vmatmul.msk.bf16.gmra.mxu2 %vm875_vm4, %v761_v20  ;;  %v628_v35 = vpop.permute.xlu0 %627 }
  0xc5   : > { %v742_v36 = vsel %vm716_vm2, %v1937_v10, %v628_v35 }
  0xc6   : > { %v2144_v41 = vsel %vm749_vm3, %v742_v36, %v709_v39 }
  0xc7   : > { %1625 = vmatmul.msk.bf16.gmra.mxu3 %vm875_vm4, %v2128_v25 }
  0xca   : > { %v699_v10 = vpop.permute.xlu1 %698 }
  0xcc   : > { %1613 = vmatmul.msk.bf16.gmra.mxu0 %vm875_vm4, %v759_v9  ;;  %v618_v42 = vpop.permute.xlu0 %617 }
  0xcd   : > { %v732_v22 = vsel %vm716_vm2, %v1967_v40, %v618_v42 }
  0xce   : > { %1641 = vmatmul.msk.bf16.gmra.mxu1 %vm875_vm4, %v757_v31  ;;  %v765_v43 = vsel %vm749_vm3, %v732_v22, %v699_v10 }
  0xd2   : > { %v622_v40 = vpop.permute.xlu1 %621 }
  0xd3   : > { %v736_v46 = vsel %vm716_vm2, %v2001_v21, %v622_v40 }
  0xd4   : > { %1676 = vmatmul.msk.bf16.gmra.mxu2 %vm875_vm4, %v763_v37  ;;  %v701_v38 = vpop.permute.xlu0 %700  ;;  %v769_v47 = vsel %vm749_vm3, %v736_v46, %v703_v28 }
  0xd5   : > { %v767_v23 = vsel %vm749_vm3, %v734_v2, %v701_v38 }
  0xd7   : > { %1650 = vmatmul.msk.bf16.vlgmr.msrb.gmra.mxu3 %vm875_vm4, %v2144_v41 }
  0xda   : > { %v705_v31 = vpop.permute.xlu1 %704 }
  0xdc   : > { %1614 = vmatmul.msk.bf16.gmra.mxu0 %vm875_vm4, %v761_v20  ;;  %v624_v14 = vpop.permute.xlu0 %623 }
  0xdd   : > { %v738_v48 = vsel %vm716_vm2, %v2033_v53, %v624_v14  ;;  %v2188_v53 = vld [vmem:[%s2418_s2] ss:$0 sm:$0xff] }
  0xde   : > { %1642 = vmatmul.msk.bf16.gmra.mxu1 %vm875_vm4, %v759_v9  ;;  %v2177_v49 = vsel %vm749_vm3, %v738_v48, %v705_v31 }
  0xe4   : > { %1677 = vmatmul.msk.bf16.gmra.mxu2 %vm875_vm4, %v765_v43  ;;  %v707_v60 = vpop.permute.xlu0 %706 }
  0xe7   : > { %1651 = vmatmul.msk.bf16.gmra.mxu3 %vm875_vm4, %v2066_v0 }
  0xec   : > { %1615 = vmatmul.msk.bf16.gmra.mxu0 %vm875_vm4, %v763_v37 }
  0xee   : > { %1643 = vmatmul.msk.bf16.gmra.mxu1 %vm875_vm4, %v761_v20 }
  0xf4   : > { %1678 = vmatmul.msk.bf16.gmra.mxu2 %vm875_vm4, %v767_v23 }
  0xf7   : > { %1652 = vmatmul.msk.bf16.gmra.mxu3 %vm875_vm4, %v2090_v29 }
  0xf9   : > { %v626_v54 = vpop.permute.xlu2 %625 }
  0xfc   : > { %1616 = vmatmul.msk.bf16.gmra.mxu0 %vm875_vm4, %v765_v43 }
  0xfe   : > { %1644 = vmatmul.msk.bf16.gmra.mxu1 %vm875_vm4, %v763_v37 }
 0x104   : > { %1679 = vmatmul.msk.bf16.gmra.mxu2 %vm875_vm4, %v769_v47 }
 0x107   : > { %1653 = vmatmul.msk.bf16.gmra.mxu3 %vm875_vm4, %v2114_v16 }
 0x10c   : > { %1617 = vmatmul.msk.bf16.gmra.mxu0 %vm875_vm4, %v767_v23 }
 0x10e   : > { %1645 = vmatmul.msk.bf16.gmra.mxu1 %vm875_vm4, %v765_v43 }
 0x112   : > { %v1142_v21 = vpop.f32.mrf.mxu2 }
 0x114   : > { %1680 = vmatmul.msk.bf16.gmra.mxu2 %vm875_vm4, %v2177_v49 }
 0x117   : > { %1684 = vmatmul.msk.bf16.vlgmr.msra.gmra.mxu3 %vm875_vm4, %v2090_v29  ;;  %v740_v29 = vsel %vm716_vm2, %v2051_v18, %v626_v54 }
 0x118   : > { %v2201_v63 = vsel %vm749_vm3, %v740_v29, %v707_v60 }
 0x119   : > { %v917_v50 = vpop.f32.mrf.mxu0  ;;  %v839_v14 = vpop.permute.xlu2 %838 }
 0x11a   : > { %v2183_v51 = vpop.f32.mrf.mxu3  ;;  %v1144_v61 = vpop.f32.mrf.mxu2 }
 0x11b   : > { %v1026_v52 = vpop.f32.mrf.mxu1 }
 0x11c   : > { %v1027_v55 = vadd.f32 %v1026_v52, %v917_v50  ;;  %1618 = vmatmul.msk.bf16.gmra.mxu0 %vm875_vm4, %v769_v47 }
 0x11e   : > { %v1222_v56 = vadd.f32 %v1142_v21, %v1027_v55  ;;  %1646 = vmatmul.msk.bf16.gmra.mxu1 %vm875_vm4, %v767_v23 }
 0x120   : > { %v1258_v44 = vmul.f32 %v2188_v53, %v1222_v56 }
 0x121   : > { %v919_v62 = vpop.f32.mrf.mxu0 }
 0x122   : > { %v1294_v1 = vadd.f32 %v2194_v58, %v1258_v44  ;;  %v2205_v3 = vpop.f32.mrf.mxu3 }
 0x123   : > { %v1028_v5 = vpop.f32.mrf.mxu1 }
 0x124   : > { %v1326_v6 = vmax.f32 %v1294_v1, 0.0  ;;  %v1029_v7 = vadd.f32 %v1028_v5, %v919_v62  ;;  %1681 = vmatmul.msk.bf16.gmra.mxu2 %vm875_vm4, %v2201_v63 }
 0x126   : > { %v1358_v18 = vpack.c.bf16 %v1326_v6, %v1326_v6  ;;  %v1223_v8 = vadd.f32 %v1144_v61, %v1029_v7 }
 0x127   : > { %v1147_v9 = vpop.f32.mrf.mxu2  ;;  %1685 = vmatmul.msk.bf16.gmra.mxu3 %vm875_vm4, %v2114_v16 }
 0x128   : > { %1391 = vst.msk [vmem:[%s2212_s28] sm:$0xf] %vm1390_vm5, %v1358_v18  ;;  %v1259_v11 = vmul.f32 %v2188_v53, %v1223_v8 }
 0x129   : > { %v922_v13 = vpop.f32.mrf.mxu0 }
 0x12a   : > { %v1295_v15 = vadd.f32 %v2194_v58, %v1259_v11  ;;  %v2220_v12 = vpop.f32.mrf.mxu3 }
 0x12b   : > { %v1031_v17 = vpop.f32.mrf.mxu1 }
 0x12c   : > { %v1327_v19 = vmax.f32 %v1295_v15, 0.0  ;;  %v1032_v4 = vadd.f32 %v1031_v17, %v922_v13  ;;  %1619 = vmatmul.msk.bf16.gmra.mxu0 %vm875_vm4, %v2177_v49 }
 0x12e   : > { %v1359_v20 = vpack.c.bf16 %v1327_v19, %v1327_v19  ;;  %v1224_v24 = vadd.f32 %v1147_v9, %v1032_v4  ;;  %1647 = vmatmul.msk.bf16.gmra.mxu1 %vm875_vm4, %v769_v47 }
 0x12f   : > { %v1149_v16 = vpop.f32.mrf.mxu2 }
 0x130   : > { %1392 = vst.msk [vmem:[%s2212_s28 + $0x4] sm:$0xf] %vm1390_vm5, %v1359_v20  ;;  %v1260_v26 = vmul.f32 %v2188_v53, %v1224_v24 }
 0x131   : > { %v924_v30 = vpop.f32.mrf.mxu0 }
 0x132   : > { %v1296_v32 = vadd.f32 %v2194_v58, %v1260_v26  ;;  %v2229_v33 = vpop.f32.mrf.mxu3 }
 0x133   : > { %v1033_v27 = vpop.f32.mrf.mxu1 }
 0x134   : > { %v1328_v59 = vmax.f32 %v1296_v32, 0.0  ;;  %v1034_v34 = vadd.f32 %v1033_v27, %v924_v30  ;;  %1682 = vmatmul.msk.bf16.gmra.mxu2 %vm875_vm4, %v2144_v41 }
 0x136   : > { %v1360_v35 = vpack.c.bf16 %v1328_v59, %v1328_v59  ;;  %v1225_v36 = vadd.f32 %v1149_v16, %v1034_v34 }
 0x137   : > { %v1152_v37 = vpop.f32.mrf.mxu2  ;;  %1686 = vmatmul.msk.bf16.gmra.mxu3 %vm875_vm4, %v2128_v25  ;;  %v834_v25 = vpop.permute.xlu1 %833 }
 0x138   : > { %1393 = vst.msk [vmem:[%s2212_s28 + $0x8] sm:$0xf] %vm1390_vm5, %v1360_v35  ;;  %v1261_v39 = vmul.f32 %v2188_v53, %v1225_v36  ;;  %v841_v47 = vsel %vm716_vm2, %v2098_v57, %v834_v25 }
 0x139   : > { %v927_v42 = vpop.f32.mrf.mxu0 }
 0x13a   : > { %v1297_v22 = vadd.f32 %v2194_v58, %v1261_v39  ;;  %v2239_v10 = vpop.f32.mrf.mxu3 }
 0x13b   : > { %v1036_v43 = vpop.f32.mrf.mxu1 }
 0x13c   : > { %v1329_v45 = vmax.f32 %v1297_v22, 0.0  ;;  %v1037_v2 = vadd.f32 %v1036_v43, %v927_v42  ;;  %1620 = vmatmul.msk.bf16.gmra.mxu0 %vm875_vm4, %v2201_v63 }
 0x13e   : > { %v1361_v38 = vpack.c.bf16 %v1329_v45, %v1329_v45  ;;  %v1226_v23 = vadd.f32 %v1152_v37, %v1037_v2  ;;  %1648 = vmatmul.msk.bf16.gmra.mxu1 %vm875_vm4, %v2177_v49  ;;  %v843_v49 = vsel %vm749_vm3, %v841_v47, %v839_v14 }
 0x13f   : > { %v1154_v40 = vpop.f32.mrf.mxu2 }
 0x140   : > { %1394 = vst.msk [vmem:[%s2212_s28 + $0xc] sm:$0xf] %vm1390_vm5, %v1361_v38  ;;  %v1262_v46 = vmul.f32 %v2188_v53, %v1226_v23 }
 0x141   : > { %v929_v28 = vpop.f32.mrf.mxu0 }
 0x142   : > { %v1298_v48 = vadd.f32 %v2194_v58, %v1262_v46  ;;  %v2251_v31 = vpop.f32.mrf.mxu3 }
 0x143   : > { %v1038_v21 = vpop.f32.mrf.mxu1 }
 0x144   : > { %v1330_v50 = vmax.f32 %v1298_v48, 0.0  ;;  %v1039_v52 = vadd.f32 %v1038_v21, %v929_v28  ;;  %1683 = vmatmul.msk.bf16.gmra.mxu2 %vm875_vm4, %v2066_v0 }
 0x146   : > { %v1362_v54 = vpack.c.bf16 %v1330_v50, %v1330_v50  ;;  %v1227_v55 = vadd.f32 %v1154_v40, %v1039_v52 }
 0x147   : > { %v1157_v56 = vpop.f32.mrf.mxu2  ;;  %1687 = vmatmul.msk.bf16.gmra.mxu3 %vm875_vm4, %v843_v49 }
 0x148   : > { %1395 = vst.msk [vmem:[%s2212_s28 + $0x10] sm:$0xf] %vm1390_vm5, %v1362_v54  ;;  %v1263_v57 = vmul.f32 %v2188_v53, %v1227_v55 }
 0x149   : > { %v932_v29 = vpop.f32.mrf.mxu0 }
 0x14a   : > { %v1299_v60 = vadd.f32 %v2194_v58, %v1263_v57  ;;  %v2261_v61 = vpop.f32.mrf.mxu3 }
 0x14b   : > { %v1041_v44 = vpop.f32.mrf.mxu1 }
 0x14c   : > { %v1331_v62 = vmax.f32 %v1299_v60, 0.0  ;;  %v1042_v0 = vadd.f32 %v1041_v44, %v932_v29  ;;  %1621 = vmatmul.msk.bf16.gmra.mxu0 %vm875_vm4, %v2144_v41 }
 0x14e   : > { %v1363_v1 = vpack.c.bf16 %v1331_v62, %v1331_v62  ;;  %v1228_v5 = vadd.f32 %v1157_v56, %v1042_v0  ;;  %1649 = vmatmul.msk.bf16.gmra.mxu1 %vm875_vm4, %v2201_v63 }
 0x14f   : > { %v1159_v6 = vpop.f32.mrf.mxu2 }
 0x150   : > { %1396 = vst.msk [vmem:[%s2212_s28 + $0x14] sm:$0xf] %vm1390_vm5, %v1363_v1  ;;  %v1264_v7 = vmul.f32 %v2188_v53, %v1228_v5 }
 0x151   : > { %v934_v18 = vpop.f32.mrf.mxu0 }
 0x152   : > { %v1300_v8 = vadd.f32 %v2194_v58, %v1264_v7  ;;  %v2271_v9 = vpop.f32.mrf.mxu3 }
 0x153   : > { %v1043_v11 = vpop.f32.mrf.mxu1 }
 0x154   : > { %v1332_v13 = vmax.f32 %v1300_v8, 0.0  ;;  %v1044_v41 = vadd.f32 %v1043_v11, %v934_v18 }
 0x156   : > { %v1364_v15 = vpack.c.bf16 %v1332_v13, %v1332_v13  ;;  %v1229_v17 = vadd.f32 %v1159_v6, %v1044_v41 }
 0x157   : > { %v1162_v19 = vpop.f32.mrf.mxu2 }
 0x158   : > { %1397 = vst.msk [vmem:[%s2212_s28 + $0x18] sm:$0xf] %vm1390_vm5, %v1364_v15  ;;  %v1265_v63 = vmul.f32 %v2188_v53, %v1229_v17 }
 0x159   : > { %v937_v4 = vpop.f32.mrf.mxu0 }
 0x15a   : > { %v1301_v20 = vadd.f32 %v2194_v58, %v1265_v63  ;;  %v2277_v24 = vpop.f32.mrf.mxu3 }
 0x15b   : > { %v1046_v16 = vpop.f32.mrf.mxu1 }
 0x15c   : > { %v1333_v26 = vmax.f32 %v1301_v20, 0.0  ;;  %v1047_v30 = vadd.f32 %v1046_v16, %v937_v4 }
 0x15e   : > { %v1365_v32 = vpack.c.bf16 %v1333_v26, %v1333_v26  ;;  %v1230_v27 = vadd.f32 %v1162_v19, %v1047_v30 }
 0x15f   : > { %v1164_v59 = vpop.f32.mrf.mxu2 }
 0x160   : > { %1398 = vst.msk [vmem:[%s2212_s28 + $0x1c] sm:$0xf] %vm1390_vm5, %v1365_v32  ;;  %v1266_v34 = vmul.f32 %v2188_v53, %v1230_v27 }
 0x161   : > { %v939_v35 = vpop.f32.mrf.mxu0 }
 0x162   : > { %v1302_v36 = vadd.f32 %v2194_v58, %v1266_v34  ;;  %v2283_v37 = vpop.f32.mrf.mxu3 }
 0x163   : > { %v1048_v39 = vpop.f32.mrf.mxu1 }
 0x164   : > { %v1334_v42 = vmax.f32 %v1302_v36, 0.0  ;;  %v1049_v22 = vadd.f32 %v1048_v39, %v939_v35 }
 0x166   : > { %v1366_v43 = vpack.c.bf16 %v1334_v42, %v1334_v42  ;;  %v1231_v45 = vadd.f32 %v1164_v59, %v1049_v22 }
 0x167   : > { %v1167_v2 = vpop.f32.mrf.mxu2 }
 0x168   : > { %1399 = vst.msk [vmem:[%s2212_s28 + $0x20] sm:$0xf] %vm1390_vm5, %v1366_v43  ;;  %v1267_v38 = vmul.f32 %v2188_v53, %v1231_v45 }
 0x169   : > { %v942_v23 = vpop.f32.mrf.mxu0 }
 0x16a   : > { %v1303_v25 = vadd.f32 %v2194_v58, %v1267_v38  ;;  %v2289_v40 = vpop.f32.mrf.mxu3 }
 0x16b   : > { %v1051_v46 = vpop.f32.mrf.mxu1 }
 0x16c   : > { %v1335_v28 = vmax.f32 %v1303_v25, 0.0  ;;  %v1052_v47 = vadd.f32 %v1051_v46, %v942_v23 }
 0x16e   : > { %v1367_v14 = vpack.c.bf16 %v1335_v28, %v1335_v28  ;;  %v1232_v48 = vadd.f32 %v1167_v2, %v1052_v47 }
 0x16f   : > { %v1169_v21 = vpop.f32.mrf.mxu2 }
 0x170   : > { %1400 = vst.msk [vmem:[%s2212_s28 + $0x24] sm:$0xf] %vm1390_vm5, %v1367_v14  ;;  %v1268_v50 = vmul.f32 %v2188_v53, %v1232_v48 }
 0x171   : > { %v944_v52 = vpop.f32.mrf.mxu0 }
 0x172   : > { %v1304_v49 = vadd.f32 %v2194_v58, %v1268_v50  ;;  %v2295_v54 = vpop.f32.mrf.mxu3  ;;  %v1087_v50 = vadd.f32 %v2277_v24, %v2183_v51  ;;  %v1089_v24 = vadd.f32 %v2283_v37, %v2205_v3 }
 0x173   : > { %v1053_v55 = vpop.f32.mrf.mxu1 }
 0x174   : > { %v1336_v56 = vmax.f32 %v1304_v49, 0.0  ;;  %v1054_v57 = vadd.f32 %v1053_v55, %v944_v52 }
 0x176   : > { %v1368_v29 = vpack.c.bf16 %v1336_v56, %v1336_v56  ;;  %v1233_v60 = vadd.f32 %v1169_v21, %v1054_v57 }
 0x177   : > { %v1172_v44 = vpop.f32.mrf.mxu2 }
 0x178   : > { %1401 = vst.msk [vmem:[%s2212_s28 + $0x28] sm:$0xf] %vm1390_vm5, %v1368_v29  ;;  %v1269_v62 = vmul.f32 %v2188_v53, %v1233_v60 }
 0x179   : > { %v947_v0 = vpop.f32.mrf.mxu0 }
 0x17a   : > { %v1305_v1 = vadd.f32 %v2194_v58, %v1269_v62  ;;  %v2301_v5 = vpop.f32.mrf.mxu3 }
 0x17b   : > { %v1056_v6 = vpop.f32.mrf.mxu1 }
 0x17c   : > { %v1337_v7 = vmax.f32 %v1305_v1, 0.0  ;;  %v1057_v18 = vadd.f32 %v1056_v6, %v947_v0 }
 0x17e   : > { %v1369_v8 = vpack.c.bf16 %v1337_v7, %v1337_v7  ;;  %v1234_v11 = vadd.f32 %v1172_v44, %v1057_v18 }
 0x17f   : > { %v1174_v13 = vpop.f32.mrf.mxu2 }
 0x180   : > { %1402 = vst.msk [vmem:[%s2212_s28 + $0x2c] sm:$0xf] %vm1390_vm5, %v1369_v8  ;;  %v1270_v41 = vmul.f32 %v2188_v53, %v1234_v11 }
 0x181   : > { %v949_v15 = vpop.f32.mrf.mxu0 }
 0x182   : > { %v1306_v17 = vadd.f32 %v2194_v58, %v1270_v41  ;;  %v2307_v19 = vpop.f32.mrf.mxu3 }
 0x183   : > { %v1058_v63 = vpop.f32.mrf.mxu1 }
 0x184   : > { %v1338_v4 = vmax.f32 %v1306_v17, 0.0  ;;  %v1059_v20 = vadd.f32 %v1058_v63, %v949_v15 }
 0x186   : > { %v1370_v16 = vpack.c.bf16 %v1338_v4, %v1338_v4  ;;  %v1235_v26 = vadd.f32 %v1174_v13, %v1059_v20 }
 0x187   : > { %v1177_v30 = vpop.f32.mrf.mxu2 }
 0x188   : > { %1403 = vst.msk [vmem:[%s2212_s28 + $0x30] sm:$0xf] %vm1390_vm5, %v1370_v16  ;;  %v1271_v32 = vmul.f32 %v2188_v53, %v1235_v26 }
 0x189   : > { %v952_v27 = vpop.f32.mrf.mxu0 }
 0x18a   : > { %v1307_v59 = vadd.f32 %v2194_v58, %v1271_v32  ;;  %v2313_v34 = vpop.f32.mrf.mxu3 }
 0x18b   : > { %v1061_v35 = vpop.f32.mrf.mxu1 }
 0x18c   : > { %v1339_v36 = vmax.f32 %v1307_v59, 0.0  ;;  %v1062_v39 = vadd.f32 %v1061_v35, %v952_v27 }
 0x18e   : > { %v1371_v42 = vpack.c.bf16 %v1339_v36, %v1339_v36  ;;  %v1236_v22 = vadd.f32 %v1177_v30, %v1062_v39  ;;  %v1092_v30 = vadd.f32 %v2289_v40, %v2220_v12 }
 0x18f   : > { %v1179_v43 = vpop.f32.mrf.mxu2 }
 0x190   : > { %1404 = vst.msk [vmem:[%s2212_s28 + $0x34] sm:$0xf] %vm1390_vm5, %v1371_v42  ;;  %v1272_v45 = vmul.f32 %v2188_v53, %v1236_v22 }
 0x191   : > { %v954_v2 = vpop.f32.mrf.mxu0 }
 0x192   : > { %v1308_v38 = vadd.f32 %v2194_v58, %v1272_v45  ;;  %v2319_v23 = vpop.f32.mrf.mxu3 }
 0x193   : > { %v1063_v25 = vpop.f32.mrf.mxu1 }
 0x194   : > { %v1340_v46 = vmax.f32 %v1308_v38, 0.0  ;;  %v1064_v28 = vadd.f32 %v1063_v25, %v954_v2 }
 0x196   : > { %v1372_v47 = vpack.c.bf16 %v1340_v46, %v1340_v46  ;;  %v1237_v14 = vadd.f32 %v1179_v43, %v1064_v28  ;;  %v1094_v46 = vadd.f32 %v2295_v54, %v2229_v33 }
 0x197   : > { %v1182_v48 = vpop.f32.mrf.mxu2 }
 0x198   : > { %1405 = vst.msk [vmem:[%s2212_s28 + $0x38] sm:$0xf] %vm1390_vm5, %v1372_v47  ;;  %v1273_v21 = vmul.f32 %v2188_v53, %v1237_v14 }
 0x199   : > { %v957_v52 = vpop.f32.mrf.mxu0 }
 0x19a   : > { %v1309_v49 = vadd.f32 %v2194_v58, %v1273_v21  ;;  %v1202_v55 = vpop.f32.mrf.mxu3 }
 0x19b   : > { %v1246_v56 = vadd.f32 %v1202_v55, %v1087_v50  ;;  %v1066_v57 = vpop.f32.mrf.mxu1 }
 0x19c   : > { %v1341_v29 = vmax.f32 %v1309_v49, 0.0  ;;  %v1067_v60 = vadd.f32 %v1066_v57, %v957_v52 }
 0x19d   : > { %v1282_v44 = vmul.f32 %v2188_v53, %v1246_v56 }
 0x19e   : > { %v1373_v62 = vpack.c.bf16 %v1341_v29, %v1341_v29  ;;  %v1238_v0 = vadd.f32 %v1182_v48, %v1067_v60 }
 0x19f   : > { %v1318_v1 = vadd.f32 %v2194_v58, %v1282_v44  ;;  %v1184_v6 = vpop.f32.mrf.mxu2  ;;  %v1097_v44 = vadd.f32 %v2301_v5, %v2239_v10  ;;  %v1099_v5 = vadd.f32 %v2307_v19, %v2251_v31 }
 0x1a0   : > { %1406 = vst.msk [vmem:[%s2212_s28 + $0x3c] sm:$0xf] %vm1390_vm5, %v1373_v62  ;;  %v1274_v51 = vmul.f32 %v2188_v53, %v1238_v0 }
 0x1a1   : > { %v1350_v7 = vmax.f32 %v1318_v1, 0.0  ;;  %v959_v18 = vpop.f32.mrf.mxu0 }
 0x1a2   : > { %v1310_v8 = vadd.f32 %v2194_v58, %v1274_v51  ;;  %v1204_v11 = vpop.f32.mrf.mxu3 }
 0x1a3   : > { %v1382_v13 = vpack.c.bf16 %v1350_v7, %v1350_v7  ;;  %v1247_v41 = vadd.f32 %v1204_v11, %v1089_v24  ;;  %v1068_v15 = vpop.f32.mrf.mxu1 }
 0x1a4   : > { %v1342_v17 = vmax.f32 %v1310_v8, 0.0  ;;  %v1069_v63 = vadd.f32 %v1068_v15, %v959_v18 }
 0x1a5   : > { %1415 = vst.msk [vmem:[%s2212_s28 + $0x60] sm:$0xf] %vm1390_vm5, %v1382_v13  ;;  %v1283_v4 = vmul.f32 %v2188_v53, %v1247_v41 }
 0x1a6   : > { %v1374_v20 = vpack.c.bf16 %v1342_v17, %v1342_v17  ;;  %v1239_v16 = vadd.f32 %v1184_v6, %v1069_v63 }
 0x1a7   : > { %v1319_v3 = vadd.f32 %v2194_v58, %v1283_v4  ;;  %v1187_v37 = vpop.f32.mrf.mxu2 }
 0x1a8   : > { %1407 = vst.msk [vmem:[%s2212_s28 + $0x40] sm:$0xf] %vm1390_vm5, %v1374_v20  ;;  %v1275_v26 = vmul.f32 %v2188_v53, %v1239_v16 }
 0x1a9   : > { %v1351_v32 = vmax.f32 %v1319_v3, 0.0  ;;  %v962_v27 = vpop.f32.mrf.mxu0 }
 0x1aa   : > { %v1311_v59 = vadd.f32 %v2194_v58, %v1275_v26  ;;  %v1207_v35 = vpop.f32.mrf.mxu3 }
 0x1ab   : > { %v1383_v36 = vpack.c.bf16 %v1351_v32, %v1351_v32  ;;  %v1248_v39 = vadd.f32 %v1207_v35, %v1092_v30  ;;  %v1071_v42 = vpop.f32.mrf.mxu1 }
 0x1ac   : > { %v1343_v22 = vmax.f32 %v1311_v59, 0.0  ;;  %v1072_v43 = vadd.f32 %v1071_v42, %v962_v27 }
 0x1ad   : > { %1416 = vst.msk [vmem:[%s2212_s28 + $0x64] sm:$0xf] %vm1390_vm5, %v1383_v36  ;;  %v1284_v45 = vmul.f32 %v2188_v53, %v1248_v39  ;;  %v1102_v36 = vadd.f32 %v2313_v34, %v2261_v61 }
 0x1ae   : > { %v1375_v2 = vpack.c.bf16 %v1343_v22, %v1343_v22  ;;  %v1240_v38 = vadd.f32 %v1187_v37, %v1072_v43 }
 0x1af   : > { %v1320_v12 = vadd.f32 %v2194_v58, %v1284_v45  ;;  %v1189_v40 = vpop.f32.mrf.mxu2 }
 0x1b0   : > { %1408 = vst.msk [vmem:[%s2212_s28 + $0x44] sm:$0xf] %vm1390_vm5, %v1375_v2  ;;  %v1276_v25 = vmul.f32 %v2188_v53, %v1240_v38 }
 0x1b1   : > { %v1352_v28 = vmax.f32 %v1320_v12, 0.0  ;;  %v964_v47 = vpop.f32.mrf.mxu0 }
 0x1b2   : > { %v1312_v14 = vadd.f32 %v2194_v58, %v1276_v25  ;;  %v1209_v48 = vpop.f32.mrf.mxu3 }
 0x1b3   : > { %v1384_v21 = vpack.c.bf16 %v1352_v28, %v1352_v28  ;;  %v1249_v50 = vadd.f32 %v1209_v48, %v1094_v46  ;;  %v1073_v52 = vpop.f32.mrf.mxu1 }
 0x1b4   : > { %v1344_v49 = vmax.f32 %v1312_v14, 0.0  ;;  %v1074_v55 = vadd.f32 %v1073_v52, %v964_v47  ;;  %v1104_v14 = vadd.f32 %v2319_v23, %v2271_v9 }
 0x1b5   : > { %1417 = vst.msk [vmem:[%s2212_s28 + $0x68] sm:$0xf] %vm1390_vm5, %v1384_v21  ;;  %v1285_v56 = vmul.f32 %v2188_v53, %v1249_v50 }
 0x1b6   : > { %v1376_v57 = vpack.c.bf16 %v1344_v49, %v1344_v49  ;;  %v1241_v29 = vadd.f32 %v1189_v40, %v1074_v55 }
 0x1b7   : > { %v1321_v33 = vadd.f32 %v2194_v58, %v1285_v56  ;;  %v1192_v54 = vpop.f32.mrf.mxu2 }
 0x1b8   : > { %1409 = vst.msk [vmem:[%s2212_s28 + $0x48] sm:$0xf] %vm1390_vm5, %v1376_v57  ;;  %v1277_v60 = vmul.f32 %v2188_v53, %v1241_v29 }
 0x1b9   : > { %v1353_v62 = vmax.f32 %v1321_v33, 0.0  ;;  %v967_v0 = vpop.f32.mrf.mxu0 }
 0x1ba   : > { %v1313_v1 = vadd.f32 %v2194_v58, %v1277_v60  ;;  %v1212_v6 = vpop.f32.mrf.mxu3 }
 0x1bb   : > { %v1385_v51 = vpack.c.bf16 %v1353_v62, %v1353_v62  ;;  %v1250_v24 = vadd.f32 %v1212_v6, %v1097_v44  ;;  %v1076_v7 = vpop.f32.mrf.mxu1 }
 0x1bc   : > { %v1345_v18 = vmax.f32 %v1313_v1, 0.0  ;;  %v1077_v8 = vadd.f32 %v1076_v7, %v967_v0 }
 0x1bd   : > { %1418 = vst.msk [vmem:[%s2212_s28 + $0x6c] sm:$0xf] %vm1390_vm5, %v1385_v51  ;;  %v1286_v11 = vmul.f32 %v2188_v53, %v1250_v24 }
 0x1be   : > { %v1377_v13 = vpack.c.bf16 %v1345_v18, %v1345_v18  ;;  %v1242_v41 = vadd.f32 %v1192_v54, %v1077_v8 }
 0x1bf   : > { %v1322_v15 = vadd.f32 %v2194_v58, %v1286_v11  ;;  %v1194_v63 = vpop.f32.mrf.mxu2 }
 0x1c0   : > { %1410 = vst.msk [vmem:[%s2212_s28 + $0x4c] sm:$0xf] %vm1390_vm5, %v1377_v13  ;;  %v1278_v10 = vmul.f32 %v2188_v53, %v1242_v41 }
 0x1c1   : > { %v1354_v17 = vmax.f32 %v1322_v15, 0.0  ;;  %v969_v4 = vpop.f32.mrf.mxu0 }
 0x1c2   : > { %v1314_v20 = vadd.f32 %v2194_v58, %v1278_v10  ;;  %v1214_v16 = vpop.f32.mrf.mxu3 }
 0x1c3   : > { %v1386_v3 = vpack.c.bf16 %v1354_v17, %v1354_v17  ;;  %v1251_v37 = vadd.f32 %v1214_v16, %v1099_v5  ;;  %v1078_v26 = vpop.f32.mrf.mxu1 }
 0x1c4   : > { %v1346_v30 = vmax.f32 %v1314_v20, 0.0  ;;  %v1079_v32 = vadd.f32 %v1078_v26, %v969_v4 }
 0x1c5   : > { %1419 = vst.msk [vmem:[%s2212_s28 + $0x70] sm:$0xf] %vm1390_vm5, %v1386_v3  ;;  %v1287_v27 = vmul.f32 %v2188_v53, %v1251_v37 }
 0x1c6   : > { %v1378_v59 = vpack.c.bf16 %v1346_v30, %v1346_v30  ;;  %v1243_v35 = vadd.f32 %v1194_v63, %v1079_v32 }
 0x1c7   : > { %v1323_v31 = vadd.f32 %v2194_v58, %v1287_v27  ;;  %v1197_v2 = vpop.f32.mrf.mxu2 }
 0x1c8   : > { %1411 = vst.msk [vmem:[%s2212_s28 + $0x50] sm:$0xf] %vm1390_vm5, %v1378_v59  ;;  %v1279_v19 = vmul.f32 %v2188_v53, %v1243_v35 }
 0x1c9   : > { %v1355_v39 = vmax.f32 %v1323_v31, 0.0  ;;  %v972_v42 = vpop.f32.mrf.mxu0 }
 0x1ca   : > { %v1315_v22 = vadd.f32 %v2194_v58, %v1279_v19  ;;  %v1217_v43 = vpop.f32.mrf.mxu3 }
 0x1cb   : > { %v1387_v45 = vpack.c.bf16 %v1355_v39, %v1355_v39  ;;  %v1252_v38 = vadd.f32 %v1217_v43, %v1102_v36  ;;  %v1081_v12 = vpop.f32.mrf.mxu1 }
 0x1cc   : > { %v1347_v40 = vmax.f32 %v1315_v22, 0.0  ;;  %v1082_v25 = vadd.f32 %v1081_v12, %v972_v42 }
 0x1cd   : > { %1420 = vst.msk [vmem:[%s2212_s28 + $0x74] sm:$0xf] %vm1390_vm5, %v1387_v45  ;;  %v1288_v46 = vmul.f32 %v2188_v53, %v1252_v38 }
 0x1ce   : > { %v1379_v28 = vpack.c.bf16 %v1347_v40, %v1347_v40  ;;  %v1244_v47 = vadd.f32 %v1197_v2, %v1082_v25 }
 0x1cf   : > { %v1324_v61 = vadd.f32 %v2194_v58, %v1288_v46  ;;  %v1199_v33 = vpop.f32.mrf.mxu2 }
 0x1d0   : > { %1412 = vst.msk [vmem:[%s2212_s28 + $0x54] sm:$0xf] %vm1390_vm5, %v1379_v28  ;;  %v1280_v34 = vmul.f32 %v2188_v53, %v1244_v47 }
 0x1d1   : > { %v1356_v48 = vmax.f32 %v1324_v61, 0.0  ;;  %v974_v49 = vpop.f32.mrf.mxu0 }
 0x1d2   : > { %v1316_v21 = vadd.f32 %v2194_v58, %v1280_v34  ;;  %v1219_v50 = vpop.f32.mrf.mxu3 }
 0x1d3   : > { %v1388_v52 = vpack.c.bf16 %v1356_v48, %v1356_v48  ;;  %v1253_v55 = vadd.f32 %v1219_v50, %v1104_v14  ;;  %v1083_v56 = vpop.f32.mrf.mxu1 }
 0x1d4   : > { %v1348_v57 = vmax.f32 %v1316_v21, 0.0  ;;  %v1084_v29 = vadd.f32 %v1083_v56, %v974_v49 }
 0x1d5   : > { %1421 = vst.msk [vmem:[%s2212_s28 + $0x78] sm:$0xf] %vm1390_vm5, %v1388_v52  ;;  %v1289_v54 = vmul.f32 %v2188_v53, %v1253_v55 }
 0x1d6   : > { %v1380_v60 = vpack.c.bf16 %v1348_v57, %v1348_v57  ;;  %v1245_v9 = vadd.f32 %v1199_v33, %v1084_v29 }
 0x1d7   : > { %v1325_v23 = vadd.f32 %v2194_v58, %v1289_v54 }
 0x1d8   : > { %1413 = vst.msk [vmem:[%s2212_s28 + $0x58] sm:$0xf] %vm1390_vm5, %v1380_v60  ;;  %v1281_v44 = vmul.f32 %v2188_v53, %v1245_v9 }
 0x1d9   : > { %v1357_v62 = vmax.f32 %v1325_v23, 0.0 }
 0x1da   : > { %v1317_v0 = vadd.f32 %v2194_v58, %v1281_v44 }
 0x1db   : > { %v1389_v1 = vpack.c.bf16 %v1357_v62, %v1357_v62 }
 0x1dc   : > { %v1349_v6 = vmax.f32 %v1317_v0, 0.0 }
 0x1dd   : > { %1422 = vst.msk [vmem:[%s2212_s28 + $0x7c] sm:$0xf] %vm1390_vm5, %v1389_v1 }
 0x1de   : > { %v1381_v51 = vpack.c.bf16 %v1349_v6, %v1349_v6 }
 0x1e0   : > { %1414 = vst.msk [vmem:[%s2212_s28 + $0x5c] sm:$0xf] %vm1390_vm5, %v1381_v51 }
 0x1e1 PF: > { %s14_s17 = sadd.s32 1, %s1778_s17   ;;  %s2421_s15 = smov %s1774_s16 }
 0x1e2   : > { %p11_p5 = scmp.ge.s32.totalorder %s14_s17, 4   ;;  %s2422_s16 = smov %s2424_s18 }
 0x1e4   :  { %13 = sbr.rel (!%p11_p5) target bundleno = 2 (0x2), region = 69 }

</bundles_post_ra>
